<compile_context>
chip_gen: v6e
topology: v6e:2x2x1
jax: 0.10.0
libtpu: 0.0.40
codegen_flags: <defaults>
</compile_context>

<pallas_src>
import functools
import math

import jax
import jax.numpy as jnp
from jax.experimental import pallas as pl
from jax.experimental.pallas import tpu as pltpu


# ------------------------- small helpers -------------------------

def _round_up(x, m):
    return ((x + m - 1) // m) * m


def _pick_tile(dim, target, align):
    """Tile size (multiple of `align`) dividing the padded dim; returns (tile, padded)."""
    padded = _round_up(dim, align)
    tile = min(_round_up(target, align), padded)
    while padded % tile:
        tile -= align
    return tile, padded


def _heads_per_block(num_heads, dh):
    """Smallest head-group whose lane width is a multiple of 128 (else all heads)."""
    for c in range(1, num_heads + 1):
        if num_heads % c == 0 and (c * dh) % 128 == 0:
            return c
    return num_heads


# ------------------------- Pallas kernels -------------------------

def _linear_kernel(x_ref, w_ref, b_ref, *refs,
                   activation, has_residual, has_ln, n_valid, ln_eps):
    idx = 0
    r_ref = g_ref = be_ref = None
    if has_residual:
        r_ref = refs[idx]; idx += 1
    if has_ln:
        g_ref = refs[idx]; be_ref = refs[idx + 1]; idx += 2
    o_ref = refs[idx]
    acc_ref = refs[idx + 1]

    @pl.when(pl.program_id(2) == 0)
    def _():
        acc_ref[...] = jnp.zeros_like(acc_ref)

    acc_ref[...] += jnp.dot(x_ref[...], w_ref[...],
                            preferred_element_type=jnp.float32)

    @pl.when(pl.program_id(2) == pl.num_programs(2) - 1)
    def _():
        y = acc_ref[...] + b_ref[...].astype(jnp.float32)
        if activation == "gelu":
            # TODO(synk): PyTorch nn.GELU default is exact erf-GELU; tanh approx used here.
            c = math.sqrt(2.0 / math.pi)
            y = 0.5 * y * (1.0 + jnp.tanh(c * (y + 0.044715 * y * y * y)))
        if has_residual:
            y = y + r_ref[...].astype(jnp.float32)
        if has_ln:
            tn = y.shape[-1]
            if n_valid < tn:   # padded feature columns must not pollute the stats
                mask = jax.lax.broadcasted_iota(jnp.int32, y.shape, 1) < n_valid
                ym = jnp.where(mask, y, 0.0)
            else:
                ym = y
            mean = jnp.sum(ym, axis=-1, keepdims=True) * (1.0 / n_valid)
            xc = y - mean
            xcm = jnp.where(mask, xc, 0.0) if n_valid < tn else xc
            var = jnp.sum(xcm * xcm, axis=-1, keepdims=True) * (1.0 / n_valid)
            y = xc * jax.lax.rsqrt(var + ln_eps)
            y = y * g_ref[...].astype(jnp.float32) + be_ref[...].astype(jnp.float32)
        o_ref[...] = y.astype(o_ref.dtype)


def _layernorm_kernel(x_ref, g_ref, b_ref, o_ref, *, eps):
    x = x_ref[...].astype(jnp.float32)
    mean = jnp.mean(x, axis=-1, keepdims=True)
    xc = x - mean
    var = jnp.mean(xc * xc, axis=-1, keepdims=True)
    y = xc * jax.lax.rsqrt(var + eps)
    o_ref[...] = (y * g_ref[...].astype(jnp.float32)
                  + b_ref[...].astype(jnp.float32)).astype(o_ref.dtype)


def _attention_kernel(q_ref, k_ref, v_ref, *refs, scale, has_bias, heads, dh):
    if has_bias:
        bias_ref, o_ref = refs
    else:
        (o_ref,) = refs
    bias = bias_ref[...].astype(jnp.float32) if has_bias else None   # (1, Sk)

    outs = []
    for h in range(heads):                                 # heads within this group
        q = q_ref[:, h * dh:(h + 1) * dh]                  # (Sq, dh)
        k = k_ref[:, h * dh:(h + 1) * dh]                  # (Sk, dh)
        v = v_ref[:, h * dh:(h + 1) * dh]
        s = jax.lax.dot_general(q, k, (((1,), (1,)), ((), ())),
                                preferred_element_type=jnp.float32) * scale
        if has_bias:
            s = s + bias                                   # broadcast over Sq
        m = jnp.max(s, axis=-1, keepdims=True)
        p = jnp.exp(s - m)
        denom = jnp.sum(p, axis=-1, keepdims=True)
        p = p * pl.reciprocal(denom, approx=True)
        outs.append(jnp.dot(p.astype(v.dtype), v, preferred_element_type=jnp.float32))
    o = outs[0] if len(outs) == 1 else jnp.concatenate(outs, axis=-1)
    o_ref[...] = o.astype(o_ref.dtype)                     # one lane-dense store


# ------------------------- kernel wrappers -------------------------

def linear(x, w, b, activation=None, residual=None, ln=None):
    """y = x @ w + b, optional GELU, optional fused residual add, optional fused
    LayerNorm over the output features (ln = (gamma, beta, eps))."""
    orig = x.shape
    K = orig[-1]
    M = math.prod(orig[:-1])
    N = w.shape[1]

    tm, Mp = _pick_tile(M, 512, 8)
    if tm < 128 and M > 128:          # avoid tiny row tiles -> repeated weight re-reads
        tm = min(512, _round_up(M, 8))
        Mp = _round_up(M, tm)
    tk, Kp = _pick_tile(K, 512, 128)
    if ln is not None:                # LN needs the full feature row in one tile
        Np = _round_up(N, 128)
        tn = Np
    else:
        tn, Np = _pick_tile(N, 512, 128)

    x2 = x.reshape(M, K)
    xp = x2 if (Mp == M and Kp == K) else jnp.pad(x2, ((0, Mp - M), (0, Kp - K)))
    wp = w if (Kp == K and Np == N) else jnp.pad(w, ((0, Kp - K), (0, Np - N)))
    b2 = b.reshape(1, N)
    bp = b2 if Np == N else jnp.pad(b2, ((0, 0), (0, Np - N)))

    in_specs = [
        pl.BlockSpec((tm, tk), lambda i, j, k: (i, k)),
        pl.BlockSpec((tk, tn), lambda i, j, k: (k, j)),
        pl.BlockSpec((1, tn), lambda i, j, k: (0, j)),
    ]
    args = [xp, wp, bp]
    if residual is not None:
        r2 = residual.reshape(M, N)
        rp = r2 if (Mp == M and Np == N) else jnp.pad(r2, ((0, Mp - M), (0, Np - N)))
        in_specs.append(pl.BlockSpec((tm, tn), lambda i, j, k: (i, j)))
        args.append(rp)
    ln_eps = 0.0
    if ln is not None:
        g, be, ln_eps = ln
        g2, be2 = g.reshape(1, N), be.reshape(1, N)
        if Np != N:
            g2 = jnp.pad(g2, ((0, 0), (0, Np - N)))
            be2 = jnp.pad(be2, ((0, 0), (0, Np - N)))
        in_specs += [pl.BlockSpec((1, tn), lambda i, j, k: (0, j)),
                     pl.BlockSpec((1, tn), lambda i, j, k: (0, j))]
        args += [g2, be2]

    out = pl.pallas_call(
        functools.partial(_linear_kernel, activation=activation,
                          has_residual=residual is not None,
                          has_ln=ln is not None, n_valid=N, ln_eps=ln_eps),
        out_shape=jax.ShapeDtypeStruct((Mp, Np), x.dtype),
        grid=(Mp // tm, Np // tn, Kp // tk),
        in_specs=in_specs,
        out_specs=pl.BlockSpec((tm, tn), lambda i, j, k: (i, j)),
        scratch_shapes=[pltpu.VMEM((tm, tn), jnp.float32)],
        compiler_params=pltpu.CompilerParams(
            dimension_semantics=("parallel", "parallel", "arbitrary"),
            vmem_limit_bytes=32 * 1024 * 1024),
    )(*args)
    if Mp != M or Np != N:
        out = out[:M, :N]
    return out.reshape(orig[:-1] + (N,))


def layernorm(x, g, b, eps):
    """LayerNorm over the last dim (stats in f32)."""
    orig = x.shape
    D = orig[-1]
    M = math.prod(orig[:-1])
    tr, Mp = _pick_tile(M, 256, 8)

    x2 = x.reshape(M, D)
    xp = x2 if Mp == M else jnp.pad(x2, ((0, Mp - M), (0, 0)))

    out = pl.pallas_call(
        functools.partial(_layernorm_kernel, eps=eps),
        out_shape=jax.ShapeDtypeStruct((Mp, D), x.dtype),
        grid=(Mp // tr,),
        in_specs=[pl.BlockSpec((tr, D), lambda i: (i, 0)),
                  pl.BlockSpec((1, D), lambda i: (0, 0)),
                  pl.BlockSpec((1, D), lambda i: (0, 0))],
        out_specs=pl.BlockSpec((tr, D), lambda i: (i, 0)),
        compiler_params=pltpu.CompilerParams(dimension_semantics=("parallel",)),
    )(xp, g.reshape(1, D), b.reshape(1, D))
    if Mp != M:
        out = out[:M]
    return out.reshape(orig)


def attention(q, k, v, bias, scale, num_heads):
    """q: (B,Sq,D), k/v: (B,Sk,D) with D = num_heads*dh (no head transposes).
    bias: None or additive f32 key bias of shape (B,1,Sk)."""
    B, Sq, D = q.shape
    Sk = k.shape[1]
    dh = D // num_heads
    hpb = _heads_per_block(num_heads, dh)     # lane-dense head group (>=128 lanes)
    G = num_heads // hpb
    width = hpb * dh

    has_bias = bias is not None
    in_specs = [pl.BlockSpec((None, Sq, width), lambda b, g: (b, 0, g)),
                pl.BlockSpec((None, Sk, width), lambda b, g: (b, 0, g)),
                pl.BlockSpec((None, Sk, width), lambda b, g: (b, 0, g))]
    args = [q, k, v]
    if has_bias:
        in_specs.append(pl.BlockSpec((None, 1, Sk), lambda b, g: (b, 0, 0)))
        args.append(bias)

    return pl.pallas_call(
        functools.partial(_attention_kernel, scale=scale, has_bias=has_bias,
                          heads=hpb, dh=dh),
        out_shape=jax.ShapeDtypeStruct((B, Sq, D), q.dtype),
        grid=(B, G),
        in_specs=in_specs,
        out_specs=pl.BlockSpec((None, Sq, width), lambda b, g: (b, 0, g)),
        compiler_params=pltpu.CompilerParams(
            dimension_semantics=("parallel", "parallel")),
    )(*args)


# ------------------------- model glue -------------------------

def patchify(image, P):
    """NCHW -> (B, N, C*P*P), flatten order (c, ph, pw) matching Conv2d weight flatten."""
    B, C, H, W = image.shape
    x = image.reshape(B, C, H // P, P, W // P, P)
    x = x.transpose(0, 2, 4, 1, 3, 5)
    return x.reshape(B, (H // P) * (W // P), C * P * P)


def vit_forward(p, cfg, image):
    B = image.shape[0]
    D, nH = cfg["vis_dim"], cfg["vis_heads"]
    dh = D // nH
    image = image.astype(p["cls_token"].dtype)            # bf16 compute
    patches = patchify(image, cfg["patch"])
    x = linear(patches, p["patch_w"], p["patch_b"])        # patch embed (conv as matmul)
    cls = jnp.broadcast_to(p["cls_token"], (B, 1, D)).astype(x.dtype)
    x = jnp.concatenate([cls, x], axis=1)
    S = x.shape[1]
    x = x + p["pos_embed"][:, :S, :]
    scale = dh ** -0.5
    for blk in p["blocks"]:
        h = layernorm(x, blk["ln1_g"], blk["ln1_b"], eps=1e-6)
        qkv = linear(h, blk["qkv_w"], blk["qkv_b"])        # (B, S, 3D), lane slices below
        q, k, v = qkv[..., :D], qkv[..., D:2 * D], qkv[..., 2 * D:]
        ctx = attention(q, k, v, None, scale, nH)          # no mask -> no bias load
        x = linear(ctx, blk["proj_w"], blk["proj_b"], residual=x)
        h = layernorm(x, blk["ln2_g"], blk["ln2_b"], eps=1e-6)
        h = linear(h, blk["fc1_w"], blk["fc1_b"], activation="gelu")
        x = linear(h, blk["fc2_w"], blk["fc2_b"], residual=x)
    return layernorm(x, p["ln_g"], p["ln_b"], eps=1e-6)


def bert_forward(p, cfg, input_ids, attention_mask,
                 encoder_hidden_states=None, encoder_attention_mask=None,
                 mode="multimodal"):
    B, S = input_ids.shape
    Dt, nH = cfg["txt_dim"], cfg["txt_heads"]
    dh = Dt // nH

    we = jnp.take(p["word_emb"], input_ids, axis=0)
    pe = p["pos_emb"][:S][None, :, :]
    tte = p["tok_type_emb"][0][None, None, :]
    x = layernorm((we + pe + tte).astype(p["word_emb"].dtype),
                  p["emb_ln_g"], p["emb_ln_b"], eps=1e-12)

    # compact (B,1,Sk) additive key biases (HF-style -10000 masking), built once, f32
    self_bias = ((1.0 - attention_mask.astype(jnp.float32)) * -10000.0).reshape(B, 1, S)
    cross_bias = None
    if encoder_hidden_states is not None:
        Skv = encoder_hidden_states.shape[1]
        cross_bias = ((1.0 - encoder_attention_mask.astype(jnp.float32))
                      * -10000.0).reshape(B, 1, Skv)
        encoder_hidden_states = encoder_hidden_states.astype(x.dtype)

    scale = 1.0 / math.sqrt(dh)
    for lyr in p["layers"]:
        # self-attention; BertSelfOutput LN fused into the output projection matmul
        q = linear(x, lyr["q_w"], lyr["q_b"])
        k = linear(x, lyr["k_w"], lyr["k_b"])
        v = linear(x, lyr["v_w"], lyr["v_b"])
        ctx = attention(q, k, v, self_bias, scale, nH)
        x = linear(ctx, lyr["ao_w"], lyr["ao_b"], residual=x,
                   ln=(lyr["ao_ln_g"], lyr["ao_ln_b"], 1e-12))
        # cross-attention (multimodal mode only)
        if mode == "multimodal" and encoder_hidden_states is not None:
            q = linear(x, lyr["cq_w"], lyr["cq_b"])
            k = linear(encoder_hidden_states, lyr["ck_w"], lyr["ck_b"])
            v = linear(encoder_hidden_states, lyr["cv_w"], lyr["cv_b"])
            ctx = attention(q, k, v, cross_bias, scale, nH)
            x = linear(ctx, lyr["co_w"], lyr["co_b"], residual=x,
                       ln=(lyr["co_ln_g"], lyr["co_ln_b"], 1e-12))
        # FFN; BertOutput LN fused into the down-projection matmul
        h = linear(x, lyr["i_w"], lyr["i_b"], activation="gelu")
        x = linear(h, lyr["o_w"], lyr["o_b"], residual=x,
                   ln=(lyr["o_ln_g"], lyr["o_ln_b"], 1e-12))
    return x


def blip_base_forward(params, image, caption_ids, attention_mask, cfg, mode):
    assert mode in ["image", "text", "multimodal"], \
        "mode parameter must be image, text, or multimodal"
    # TODO(synk): BertTokenizer has no Pallas/JAX equivalent; caption is pre-tokenized ids.
    if mode == "image":
        return vit_forward(params["vis"], cfg, image)
    elif mode == "text":
        return bert_forward(params["txt"], cfg, caption_ids, attention_mask, mode="text")
    else:
        image_embeds = vit_forward(params["vis"], cfg, image)
        image_atts = jnp.ones(image_embeds.shape[:-1], jnp.int32)
        input_ids = caption_ids.at[:, 0].set(cfg["enc_token_id"])
        return bert_forward(params["txt"], cfg, input_ids, attention_mask,
                            encoder_hidden_states=image_embeds,
                            encoder_attention_mask=image_atts,
                            mode="multimodal")


# ------------------------- deterministic parameter init -------------------------

def init_params(key, cfg):
    dtype = cfg.get("dtype", jnp.bfloat16)
    keys = iter(jax.random.split(key, 512))

    def nrm(shape):
        return (jax.random.normal(next(keys), shape, jnp.float32) * 0.02).astype(dtype)

    def zeros(shape):
        return jnp.zeros(shape, dtype)

    def ones(shape):
        return jnp.ones(shape, dtype)

    D, P, C = cfg["vis_dim"], cfg["patch"], cfg["in_chans"]
    n_patch = (cfg["img_size"] // P) ** 2
    vis = dict(
        patch_w=nrm((C * P * P, D)), patch_b=zeros((D,)),
        cls_token=nrm((1, 1, D)), pos_embed=nrm((1, n_patch + 1, D)),
        ln_g=ones((D,)), ln_b=zeros((D,)),
        blocks=[],
    )
    for _ in range(cfg["vis_depth"]):
        vis["blocks"].append(dict(
            ln1_g=ones((D,)), ln1_b=zeros((D,)),
            qkv_w=nrm((D, 3 * D)), qkv_b=zeros((3 * D,)),
            proj_w=nrm((D, D)), proj_b=zeros((D,)),
            ln2_g=ones((D,)), ln2_b=zeros((D,)),
            fc1_w=nrm((D, 4 * D)), fc1_b=zeros((4 * D,)),
            fc2_w=nrm((4 * D, D)), fc2_b=zeros((D,)),
        ))

    Dt, I, Dv = cfg["txt_dim"], cfg["inter"], D
    txt = dict(
        word_emb=nrm((cfg["vocab"], Dt)), pos_emb=nrm((cfg["max_pos"], Dt)),
        tok_type_emb=nrm((2, Dt)),
        emb_ln_g=ones((Dt,)), emb_ln_b=zeros((Dt,)),
        layers=[],
    )
    for _ in range(cfg["txt_layers"]):
        txt["layers"].append(dict(
            q_w=nrm((Dt, Dt)), q_b=zeros((Dt,)),
            k_w=nrm((Dt, Dt)), k_b=zeros((Dt,)),
            v_w=nrm((Dt, Dt)), v_b=zeros((Dt,)),
            ao_w=nrm((Dt, Dt)), ao_b=zeros((Dt,)),
            ao_ln_g=ones((Dt,)), ao_ln_b=zeros((Dt,)),
            cq_w=nrm((Dt, Dt)), cq_b=zeros((Dt,)),
            ck_w=nrm((Dv, Dt)), ck_b=zeros((Dt,)),
            cv_w=nrm((Dv, Dt)), cv_b=zeros((Dt,)),
            co_w=nrm((Dt, Dt)), co_b=zeros((Dt,)),
            co_ln_g=ones((Dt,)), co_ln_b=zeros((Dt,)),
            i_w=nrm((Dt, I)), i_b=zeros((I,)),
            o_w=nrm((I, Dt)), o_b=zeros((Dt,)),
            o_ln_g=ones((Dt,)), o_ln_b=zeros((Dt,)),
        ))
    return dict(vis=vis, txt=txt)


# ------------------------- main -------------------------

if __name__ == "__main__":
    cfg = dict(
        img_size=16, patch=8, in_chans=3,
        vis_dim=32, vis_depth=2, vis_heads=4,
        vocab=64, max_pos=16, txt_dim=32, txt_layers=2, txt_heads=4, inter=128,
        enc_token_id=3, dtype=jnp.bfloat16,
    )

    root = jax.random.PRNGKey(0)
    k_params, k_img, k_ids = jax.random.split(root, 3)

    params = init_params(k_params, cfg)
    image = jax.random.normal(k_img, (2, 3, 16, 16), jnp.float32)          # NCHW
    caption_ids = jax.random.randint(k_ids, (2, 8), 4, cfg["vocab"], jnp.int32)
    attention_mask = jnp.ones((2, 8), jnp.int32)

    fwd = {m: jax.jit(functools.partial(blip_base_forward, cfg=cfg, mode=m))
           for m in ("image", "text", "multimodal")}

    out_image = fwd["image"](params, image, caption_ids, attention_mask)
    out_text = fwd["text"](params, image, caption_ids, attention_mask)
    out_multi = fwd["multimodal"](params, image, caption_ids, attention_mask)

    jax.block_until_ready((out_image, out_text, out_multi))
    assert out_image.shape == (2, 5, cfg["vis_dim"])
    assert out_text.shape == (2, 8, cfg["txt_dim"])
    assert out_multi.shape == (2, 8, cfg["txt_dim"])
    print("KERNEL_OK")
</pallas_src>

<mosaic_0001>
module attributes {stable_mosaic.version = 11 : i64} {
  func.func @_linear_kernel(%arg0: i32, %arg1: i32, %arg2: i32, %arg3: memref<8x256xbf16, #tpu.memory_space<vmem>>, %arg4: memref<256x128xbf16, #tpu.memory_space<vmem>>, %arg5: memref<1x128xbf16, #tpu.memory_space<vmem>>, %arg6: memref<8x128xbf16, #tpu.memory_space<vmem>>, %arg7: memref<8x128xf32, #tpu.memory_space<vmem>>) attributes {dimension_semantics = [#tpu.dimension_semantics<parallel>, #tpu.dimension_semantics<parallel>, #tpu.dimension_semantics<arbitrary>], iteration_bounds = array<i64: 1, 1, 1>, scalar_prefetch = 0 : i64, scratch_operands = 1 : i64, tpu.core_type = #tpu.core_type<tc>, window_params = [{transform_indices = @transform_0, window_bounds = array<i64: 8, 256>}, {transform_indices = @transform_1, window_bounds = array<i64: 256, 128>}, {transform_indices = @transform_2, window_bounds = array<i64: 1, 128>}, {transform_indices = @transform_3, window_bounds = array<i64: 8, 128>}]} {
    %c0_i32 = arith.constant 0 : i32
    %0 = arith.cmpi eq, %arg2, %c0_i32 : i32
    %1 = arith.extui %0 : i1 to i32
    %c0_i32_0 = arith.constant 0 : i32
    %2 = arith.cmpi ne, %1, %c0_i32_0 : i32
    scf.if %2 {
      %cst_10 = arith.constant 0.000000e+00 : f32
      %12 = vector.broadcast %cst_10 : f32 to vector<8x128xf32>
      %c0_11 = arith.constant 0 : index
      %c0_12 = arith.constant 0 : index
      %13 = vector.load %arg7[%c0_11, %c0_12] : memref<8x128xf32, #tpu.memory_space<vmem>>, vector<8x128xf32>
      tpu.vector_store %arg7[%c0_11, %c0_12], %12 {strides = array<i32>} : memref<8x128xf32, #tpu.memory_space<vmem>>, vector<8x128xf32>,
    } else {
    }
    %c0 = arith.constant 0 : index
    %c0_1 = arith.constant 0 : index
    %3 = vector.load %arg7[%c0, %c0_1] : memref<8x128xf32, #tpu.memory_space<vmem>>, vector<8x128xf32>
    %c0_2 = arith.constant 0 : index
    %c0_3 = arith.constant 0 : index
    %4 = vector.load %arg3[%c0_2, %c0_3] : memref<8x256xbf16, #tpu.memory_space<vmem>>, vector<8x256xbf16>
    %c0_4 = arith.constant 0 : index
    %c0_5 = arith.constant 0 : index
    %5 = vector.load %arg4[%c0_4, %c0_5] : memref<256x128xbf16, #tpu.memory_space<vmem>>, vector<256x128xbf16>
    %cst = arith.constant dense<0.000000e+00> : vector<8x128xf32>
    %6 = tpu.matmul %4, %5, %cst {dimension_numbers = #tpu.dot_dimension_numbers<[1], [0], [0], [1], [0, 0, 1, 1], [], []>} : vector<8x256xbf16>, vector<256x128xbf16>, vector<8x128xf32> -> vector<8x128xf32>
    %7 = arith.addf %3, %6 : vector<8x128xf32>
    %c0_6 = arith.constant 0 : index
    %c0_7 = arith.constant 0 : index
    %8 = vector.load %arg7[%c0_6, %c0_7] : memref<8x128xf32, #tpu.memory_space<vmem>>, vector<8x128xf32>
    tpu.vector_store %arg7[%c0_6, %c0_7], %7 {strides = array<i32>} : memref<8x128xf32, #tpu.memory_space<vmem>>, vector<8x128xf32>,
    %c0_i32_8 = arith.constant 0 : i32
    %9 = arith.cmpi eq, %arg2, %c0_i32_8 : i32
    %10 = arith.extui %9 : i1 to i32
    %c0_i32_9 = arith.constant 0 : i32
    %11 = arith.cmpi ne, %10, %c0_i32_9 : i32
    scf.if %11 {
      %c0_10 = arith.constant 0 : index
      %c0_11 = arith.constant 0 : index
      %12 = vector.load %arg7[%c0_10, %c0_11] : memref<8x128xf32, #tpu.memory_space<vmem>>, vector<8x128xf32>
      %c0_12 = arith.constant 0 : index
      %c0_13 = arith.constant 0 : index
      %13 = vector.load %arg5[%c0_12, %c0_13] : memref<1x128xbf16, #tpu.memory_space<vmem>>, vector<1x128xbf16>
      %14 = arith.extf %13 : vector<1x128xbf16> to vector<1x128xf32>
      %15 = vector.broadcast %14 : vector<1x128xf32> to vector<8x128xf32>
      %16 = arith.addf %12, %15 : vector<8x128xf32>
      %17 = arith.truncf %16 : vector<8x128xf32> to vector<8x128xbf16>
      %c0_14 = arith.constant 0 : index
      %c0_15 = arith.constant 0 : index
      %18 = vector.load %arg6[%c0_14, %c0_15] : memref<8x128xbf16, #tpu.memory_space<vmem>>, vector<8x128xbf16>
      tpu.vector_store %arg6[%c0_14, %c0_15], %17 {strides = array<i32>} : memref<8x128xbf16, #tpu.memory_space<vmem>>, vector<8x128xbf16>,
    } else {
    }
    return
  }
  func.func @transform_0(%arg0: i32, %arg1: i32, %arg2: i32) -> (i32, i32) {
    %c0_i32 = arith.constant 0 : i32
    return %arg0, %arg2 : i32, i32
  }
  func.func @transform_1(%arg0: i32, %arg1: i32, %arg2: i32) -> (i32, i32) {
    %c0_i32 = arith.constant 0 : i32
    return %arg2, %arg1 : i32, i32
  }
  func.func @transform_2(%arg0: i32, %arg1: i32, %arg2: i32) -> (i32, i32) {
    %c0_i32 = arith.constant 0 : i32
    %c0_i32_0 = arith.constant 0 : i32
    return %c0_i32, %arg1 : i32, i32
  }
  func.func @transform_3(%arg0: i32, %arg1: i32, %arg2: i32) -> (i32, i32) {
    %c0_i32 = arith.constant 0 : i32
    return %arg0, %arg1 : i32, i32
  }
}

module attributes {stable_mosaic.version = 11 : i64} {
  func.func @_layernorm_kernel(%arg0: i32, %arg1: memref<16x32xbf16, #tpu.memory_space<vmem>>, %arg2: memref<1x32xbf16, #tpu.memory_space<vmem>>, %arg3: memref<1x32xbf16, #tpu.memory_space<vmem>>, %arg4: memref<16x32xbf16, #tpu.memory_space<vmem>>) attributes {dimension_semantics = [#tpu.dimension_semantics<parallel>], iteration_bounds = array<i64: 1>, scalar_prefetch = 0 : i64, scratch_operands = 0 : i64, tpu.core_type = #tpu.core_type<tc>, window_params = [{transform_indices = @transform_0, window_bounds = array<i64: 16, 32>}, {pipeline_mode = #tpu.pipeline_mode<synchronous>, transform_indices = @transform_1, window_bounds = array<i64: 1, 32>}, {pipeline_mode = #tpu.pipeline_mode<synchronous>, transform_indices = @transform_2, window_bounds = array<i64: 1, 32>}, {transform_indices = @transform_3, window_bounds = array<i64: 16, 32>}]} {
    %c0 = arith.constant 0 : index
    %c0_0 = arith.constant 0 : index
    %0 = vector.load %arg1[%c0, %c0_0] : memref<16x32xbf16, #tpu.memory_space<vmem>>, vector<16x32xbf16>
    %1 = arith.extf %0 : vector<16x32xbf16> to vector<16x32xf32>
    %cst = arith.constant dense<0.000000e+00> : vector<16xf32>
    %2 = vector.multi_reduction <add>, %1, %cst [1] : vector<16x32xf32> to vector<16xf32>
    %3 = vector.shape_cast %2 : vector<16xf32> to vector<16x1xf32>
    %cst_1 = arith.constant 3.200000e+01 : f32
    %4 = vector.broadcast %cst_1 : f32 to vector<16x1xf32>
    %5 = arith.divf %3, %4 : vector<16x1xf32>
    %6 = vector.broadcast %5 : vector<16x1xf32> to vector<16x32xf32>
    %7 = arith.subf %1, %6 : vector<16x32xf32>
    %8 = arith.mulf %7, %7 : vector<16x32xf32>
    %cst_2 = arith.constant dense<0.000000e+00> : vector<16xf32>
    %9 = vector.multi_reduction <add>, %8, %cst_2 [1] : vector<16x32xf32> to vector<16xf32>
    %10 = vector.shape_cast %9 : vector<16xf32> to vector<16x1xf32>
    %cst_3 = arith.constant 3.200000e+01 : f32
    %11 = vector.broadcast %cst_3 : f32 to vector<16x1xf32>
    %12 = arith.divf %10, %11 : vector<16x1xf32>
    %cst_4 = arith.constant 9.99999997E-7 : f32
    %13 = vector.broadcast %cst_4 : f32 to vector<16x1xf32>
    %14 = arith.addf %12, %13 : vector<16x1xf32>
    %15 = math.rsqrt %14 : vector<16x1xf32>
    %16 = vector.broadcast %15 : vector<16x1xf32> to vector<16x32xf32>
    %17 = arith.mulf %7, %16 : vector<16x32xf32>
    %c0_5 = arith.constant 0 : index
    %c0_6 = arith.constant 0 : index
    %18 = vector.load %arg2[%c0_5, %c0_6] : memref<1x32xbf16, #tpu.memory_space<vmem>>, vector<1x32xbf16>
    %19 = arith.extf %18 : vector<1x32xbf16> to vector<1x32xf32>
    %20 = vector.broadcast %19 : vector<1x32xf32> to vector<16x32xf32>
    %21 = arith.mulf %17, %20 : vector<16x32xf32>
    %c0_7 = arith.constant 0 : index
    %c0_8 = arith.constant 0 : index
    %22 = vector.load %arg3[%c0_7, %c0_8] : memref<1x32xbf16, #tpu.memory_space<vmem>>, vector<1x32xbf16>
    %23 = arith.extf %22 : vector<1x32xbf16> to vector<1x32xf32>
    %24 = vector.broadcast %23 : vector<1x32xf32> to vector<16x32xf32>
    %25 = arith.addf %21, %24 : vector<16x32xf32>
    %26 = arith.truncf %25 : vector<16x32xf32> to vector<16x32xbf16>
    %c0_9 = arith.constant 0 : index
    %c0_10 = arith.constant 0 : index
    %27 = vector.load %arg4[%c0_9, %c0_10] : memref<16x32xbf16, #tpu.memory_space<vmem>>, vector<16x32xbf16>
    tpu.vector_store %arg4[%c0_9, %c0_10], %26 {strides = array<i32>} : memref<16x32xbf16, #tpu.memory_space<vmem>>, vector<16x32xbf16>,
    return
  }
  func.func @transform_0(%arg0: i32) -> (i32, i32) {
    %c0_i32 = arith.constant 0 : i32
    %c0_i32_0 = arith.constant 0 : i32
    return %arg0, %c0_i32 : i32, i32
  }
  func.func @transform_1(%arg0: i32) -> (i32, i32) {
    %c0_i32 = arith.constant 0 : i32
    %c0_i32_0 = arith.constant 0 : i32
    %c0_i32_1 = arith.constant 0 : i32
    return %c0_i32, %c0_i32_0 : i32, i32
  }
  func.func @transform_2(%arg0: i32) -> (i32, i32) {
    %c0_i32 = arith.constant 0 : i32
    %c0_i32_0 = arith.constant 0 : i32
    %c0_i32_1 = arith.constant 0 : i32
    return %c0_i32, %c0_i32_0 : i32, i32
  }
  func.func @transform_3(%arg0: i32) -> (i32, i32) {
    %c0_i32 = arith.constant 0 : i32
    %c0_i32_0 = arith.constant 0 : i32
    return %arg0, %c0_i32 : i32, i32
  }
}

module attributes {stable_mosaic.version = 11 : i64} {
  func.func @_linear_kernel(%arg0: i32, %arg1: i32, %arg2: i32, %arg3: memref<16x128xbf16, #tpu.memory_space<vmem>>, %arg4: memref<128x128xbf16, #tpu.memory_space<vmem>>, %arg5: memref<1x128xbf16, #tpu.memory_space<vmem>>, %arg6: memref<16x128xbf16, #tpu.memory_space<vmem>>, %arg7: memref<16x128xf32, #tpu.memory_space<vmem>>) attributes {dimension_semantics = [#tpu.dimension_semantics<parallel>, #tpu.dimension_semantics<parallel>, #tpu.dimension_semantics<arbitrary>], iteration_bounds = array<i64: 1, 1, 1>, scalar_prefetch = 0 : i64, scratch_operands = 1 : i64, tpu.core_type = #tpu.core_type<tc>, window_params = [{transform_indices = @transform_0, window_bounds = array<i64: 16, 128>}, {transform_indices = @transform_1, window_bounds = array<i64: 128, 128>}, {transform_indices = @transform_2, window_bounds = array<i64: 1, 128>}, {transform_indices = @transform_3, window_bounds = array<i64: 16, 128>}]} {
    %c0_i32 = arith.constant 0 : i32
    %0 = arith.cmpi eq, %arg2, %c0_i32 : i32
    %1 = arith.extui %0 : i1 to i32
    %c0_i32_0 = arith.constant 0 : i32
    %2 = arith.cmpi ne, %1, %c0_i32_0 : i32
    scf.if %2 {
      %cst_10 = arith.constant 0.000000e+00 : f32
      %12 = vector.broadcast %cst_10 : f32 to vector<16x128xf32>
      %c0_11 = arith.constant 0 : index
      %c0_12 = arith.constant 0 : index
      %13 = vector.load %arg7[%c0_11, %c0_12] : memref<16x128xf32, #tpu.memory_space<vmem>>, vector<16x128xf32>
      tpu.vector_store %arg7[%c0_11, %c0_12], %12 {strides = array<i32>} : memref<16x128xf32, #tpu.memory_space<vmem>>, vector<16x128xf32>,
    } else {
    }
    %c0 = arith.constant 0 : index
    %c0_1 = arith.constant 0 : index
    %3 = vector.load %arg7[%c0, %c0_1] : memref<16x128xf32, #tpu.memory_space<vmem>>, vector<16x128xf32>
    %c0_2 = arith.constant 0 : index
    %c0_3 = arith.constant 0 : index
    %4 = vector.load %arg3[%c0_2, %c0_3] : memref<16x128xbf16, #tpu.memory_space<vmem>>, vector<16x128xbf16>
    %c0_4 = arith.constant 0 : index
    %c0_5 = arith.constant 0 : index
    %5 = vector.load %arg4[%c0_4, %c0_5] : memref<128x128xbf16, #tpu.memory_space<vmem>>, vector<128x128xbf16>
    %cst = arith.constant dense<0.000000e+00> : vector<16x128xf32>
    %6 = tpu.matmul %4, %5, %cst {dimension_numbers = #tpu.dot_dimension_numbers<[1], [0], [0], [1], [0, 0, 1, 1], [], []>} : vector<16x128xbf16>, vector<128x128xbf16>, vector<16x128xf32> -> vector<16x128xf32>
    %7 = arith.addf %3, %6 : vector<16x128xf32>
    %c0_6 = arith.constant 0 : index
    %c0_7 = arith.constant 0 : index
    %8 = vector.load %arg7[%c0_6, %c0_7] : memref<16x128xf32, #tpu.memory_space<vmem>>, vector<16x128xf32>
    tpu.vector_store %arg7[%c0_6, %c0_7], %7 {strides = array<i32>} : memref<16x128xf32, #tpu.memory_space<vmem>>, vector<16x128xf32>,
    %c0_i32_8 = arith.constant 0 : i32
    %9 = arith.cmpi eq, %arg2, %c0_i32_8 : i32
    %10 = arith.extui %9 : i1 to i32
    %c0_i32_9 = arith.constant 0 : i32
    %11 = arith.cmpi ne, %10, %c0_i32_9 : i32
    scf.if %11 {
      %c0_10 = arith.constant 0 : index
      %c0_11 = arith.constant 0 : index
      %12 = vector.load %arg7[%c0_10, %c0_11] : memref<16x128xf32, #tpu.memory_space<vmem>>, vector<16x128xf32>
      %c0_12 = arith.constant 0 : index
      %c0_13 = arith.constant 0 : index
      %13 = vector.load %arg5[%c0_12, %c0_13] : memref<1x128xbf16, #tpu.memory_space<vmem>>, vector<1x128xbf16>
      %14 = arith.extf %13 : vector<1x128xbf16> to vector<1x128xf32>
      %15 = vector.broadcast %14 : vector<1x128xf32> to vector<16x128xf32>
      %16 = arith.addf %12, %15 : vector<16x128xf32>
      %17 = arith.truncf %16 : vector<16x128xf32> to vector<16x128xbf16>
      %c0_14 = arith.constant 0 : index
      %c0_15 = arith.constant 0 : index
      %18 = vector.load %arg6[%c0_14, %c0_15] : memref<16x128xbf16, #tpu.memory_space<vmem>>, vector<16x128xbf16>
      tpu.vector_store %arg6[%c0_14, %c0_15], %17 {strides = array<i32>} : memref<16x128xbf16, #tpu.memory_space<vmem>>, vector<16x128xbf16>,
    } else {
    }
    return
  }
  func.func @transform_0(%arg0: i32, %arg1: i32, %arg2: i32) -> (i32, i32) {
    %c0_i32 = arith.constant 0 : i32
    return %arg0, %arg2 : i32, i32
  }
  func.func @transform_1(%arg0: i32, %arg1: i32, %arg2: i32) -> (i32, i32) {
    %c0_i32 = arith.constant 0 : i32
    return %arg2, %arg1 : i32, i32
  }
  func.func @transform_2(%arg0: i32, %arg1: i32, %arg2: i32) -> (i32, i32) {
    %c0_i32 = arith.constant 0 : i32
    %c0_i32_0 = arith.constant 0 : i32
    return %c0_i32, %arg1 : i32, i32
  }
  func.func @transform_3(%arg0: i32, %arg1: i32, %arg2: i32) -> (i32, i32) {
    %c0_i32 = arith.constant 0 : i32
    return %arg0, %arg1 : i32, i32
  }
}

module attributes {stable_mosaic.version = 11 : i64} {
  func.func @_attention_kernel(%arg0: i32, %arg1: i32, %arg2: memref<1x5x32xbf16, #tpu.memory_space<vmem>>, %arg3: memref<1x5x32xbf16, #tpu.memory_space<vmem>>, %arg4: memref<1x5x32xbf16, #tpu.memory_space<vmem>>, %arg5: memref<1x5x32xbf16, #tpu.memory_space<vmem>>) attributes {dimension_semantics = [#tpu.dimension_semantics<parallel>, #tpu.dimension_semantics<parallel>], iteration_bounds = array<i64: 2, 1>, scalar_prefetch = 0 : i64, scratch_operands = 0 : i64, tpu.core_type = #tpu.core_type<tc>, window_params = [{transform_indices = @transform_0, window_bounds = array<i64: 1, 5, 32>}, {transform_indices = @transform_1, window_bounds = array<i64: 1, 5, 32>}, {transform_indices = @transform_2, window_bounds = array<i64: 1, 5, 32>}, {transform_indices = @transform_3, window_bounds = array<i64: 1, 5, 32>}]} {
    %c0 = arith.constant 0 : index
    %c0_0 = arith.constant 0 : index
    %c0_1 = arith.constant 0 : index
    %0 = vector.load %arg2[%c0, %c0_0, %c0_1] : memref<1x5x32xbf16, #tpu.memory_space<vmem>>, vector<1x5x8xbf16>
    %1 = vector.shape_cast %0 : vector<1x5x8xbf16> to vector<5x8xbf16>
    %c0_2 = arith.constant 0 : index
    %c0_3 = arith.constant 0 : index
    %c0_4 = arith.constant 0 : index
    %2 = vector.load %arg3[%c0_2, %c0_3, %c0_4] : memref<1x5x32xbf16, #tpu.memory_space<vmem>>, vector<1x5x8xbf16>
    %3 = vector.shape_cast %2 : vector<1x5x8xbf16> to vector<5x8xbf16>
    %c0_5 = arith.constant 0 : index
    %c0_6 = arith.constant 0 : index
    %c0_7 = arith.constant 0 : index
    %4 = vector.load %arg4[%c0_5, %c0_6, %c0_7] : memref<1x5x32xbf16, #tpu.memory_space<vmem>>, vector<1x5x8xbf16>
    %5 = vector.shape_cast %4 : vector<1x5x8xbf16> to vector<5x8xbf16>
    %cst = arith.constant dense<0.000000e+00> : vector<5x5xf32>
    %6 = tpu.matmul %1, %3, %cst {dimension_numbers = #tpu.dot_dimension_numbers<[1], [1], [0], [0], [0, 0, 1, 0], [], []>} : vector<5x8xbf16>, vector<5x8xbf16>, vector<5x5xf32> -> vector<5x5xf32>
    %cst_8 = arith.constant 0.353553385 : f32
    %7 = vector.broadcast %cst_8 : f32 to vector<5x5xf32>
    %8 = arith.mulf %6, %7 : vector<5x5xf32>
    %cst_9 = arith.constant dense<0xFF800000> : vector<5xf32>
    %9 = vector.multi_reduction <maximumf>, %8, %cst_9 [1] : vector<5x5xf32> to vector<5xf32>
    %10 = vector.shape_cast %9 : vector<5xf32> to vector<5x1xf32>
    %11 = vector.broadcast %10 : vector<5x1xf32> to vector<5x5xf32>
    %12 = arith.subf %8, %11 : vector<5x5xf32>
    %13 = math.exp %12 : vector<5x5xf32>
    %cst_10 = arith.constant dense<0.000000e+00> : vector<5xf32>
    %14 = vector.multi_reduction <add>, %13, %cst_10 [1] : vector<5x5xf32> to vector<5xf32>
    %15 = vector.shape_cast %14 : vector<5xf32> to vector<5x1xf32>
    %16 = tpu.reciprocal %15 {approx = true} : vector<5x1xf32> -> vector<5x1xf32>
    %17 = vector.broadcast %16 : vector<5x1xf32> to vector<5x5xf32>
    %18 = arith.mulf %13, %17 : vector<5x5xf32>
    %19 = arith.truncf %18 : vector<5x5xf32> to vector<5x5xbf16>
    %cst_11 = arith.constant dense<0.000000e+00> : vector<5x8xf32>
    %20 = tpu.matmul %19, %5, %cst_11 {dimension_numbers = #tpu.dot_dimension_numbers<[1], [0], [0], [1], [0, 0, 1, 1], [], []>} : vector<5x5xbf16>, vector<5x8xbf16>, vector<5x8xf32> -> vector<5x8xf32>
    %c0_12 = arith.constant 0 : index
    %c0_13 = arith.constant 0 : index
    %c8 = arith.constant 8 : index
    %21 = vector.load %arg2[%c0_12, %c0_13, %c8] : memref<1x5x32xbf16, #tpu.memory_space<vmem>>, vector<1x5x8xbf16>
    %22 = vector.shape_cast %21 : vector<1x5x8xbf16> to vector<5x8xbf16>
    %c0_14 = arith.constant 0 : index
    %c0_15 = arith.constant 0 : index
    %c8_16 = arith.constant 8 : index
    %23 = vector.load %arg3[%c0_14, %c0_15, %c8_16] : memref<1x5x32xbf16, #tpu.memory_space<vmem>>, vector<1x5x8xbf16>
    %24 = vector.shape_cast %23 : vector<1x5x8xbf16> to vector<5x8xbf16>
    %c0_17 = arith.constant 0 : index
    %c0_18 = arith.constant 0 : index
    %c8_19 = arith.constant 8 : index
    %25 = vector.load %arg4[%c0_17, %c0_18, %c8_19] : memref<1x5x32xbf16, #tpu.memory_space<vmem>>, vector<1x5x8xbf16>
    %26 = vector.shape_cast %25 : vector<1x5x8xbf16> to vector<5x8xbf16>
    %cst_20 = arith.constant dense<0.000000e+00> : vector<5x5xf32>
    %27 = tpu.matmul %22, %24, %cst_20 {dimension_numbers = #tpu.dot_dimension_numbers<[1], [1], [0], [0], [0, 0, 1, 0], [], []>} : vector<5x8xbf16>, vector<5x8xbf16>, vector<5x5xf32> -> vector<5x5xf32>
    %cst_21 = arith.constant 0.353553385 : f32
    %28 = vector.broadcast %cst_21 : f32 to vector<5x5xf32>
    %29 = arith.mulf %27, %28 : vector<5x5xf32>
    %cst_22 = arith.constant dense<0xFF800000> : vector<5xf32>
    %30 = vector.multi_reduction <maximumf>, %29, %cst_22 [1] : vector<5x5xf32> to vector<5xf32>
    %31 = vector.shape_cast %30 : vector<5xf32> to vector<5x1xf32>
    %32 = vector.broadcast %31 : vector<5x1xf32> to vector<5x5xf32>
    %33 = arith.subf %29, %32 : vector<5x5xf32>
    %34 = math.exp %33 : vector<5x5xf32>
    %cst_23 = arith.constant dense<0.000000e+00> : vector<5xf32>
    %35 = vector.multi_reduction <add>, %34, %cst_23 [1] : vector<5x5xf32> to vector<5xf32>
    %36 = vector.shape_cast %35 : vector<5xf32> to vector<5x1xf32>
    %37 = tpu.reciprocal %36 {approx = true} : vector<5x1xf32> -> vector<5x1xf32>
    %38 = vector.broadcast %37 : vector<5x1xf32> to vector<5x5xf32>
    %39 = arith.mulf %34, %38 : vector<5x5xf32>
    %40 = arith.truncf %39 : vector<5x5xf32> to vector<5x5xbf16>
    %cst_24 = arith.constant dense<0.000000e+00> : vector<5x8xf32>
    %41 = tpu.matmul %40, %26, %cst_24 {dimension_numbers = #tpu.dot_dimension_numbers<[1], [0], [0], [1], [0, 0, 1, 1], [], []>} : vector<5x5xbf16>, vector<5x8xbf16>, vector<5x8xf32> -> vector<5x8xf32>
    %c0_25 = arith.constant 0 : index
    %c0_26 = arith.constant 0 : index
    %c16 = arith.constant 16 : index
    %42 = vector.load %arg2[%c0_25, %c0_26, %c16] : memref<1x5x32xbf16, #tpu.memory_space<vmem>>, vector<1x5x8xbf16>
    %43 = vector.shape_cast %42 : vector<1x5x8xbf16> to vector<5x8xbf16>
    %c0_27 = arith.constant 0 : index
    %c0_28 = arith.constant 0 : index
    %c16_29 = arith.constant 16 : index
    %44 = vector.load %arg3[%c0_27, %c0_28, %c16_29] : memref<1x5x32xbf16, #tpu.memory_space<vmem>>, vector<1x5x8xbf16>
    %45 = vector.shape_cast %44 : vector<1x5x8xbf16> to vector<5x8xbf16>
    %c0_30 = arith.constant 0 : index
    %c0_31 = arith.constant 0 : index
    %c16_32 = arith.constant 16 : index
    %46 = vector.load %arg4[%c0_30, %c0_31, %c16_32] : memref<1x5x32xbf16, #tpu.memory_space<vmem>>, vector<1x5x8xbf16>
    %47 = vector.shape_cast %46 : vector<1x5x8xbf16> to vector<5x8xbf16>
    %cst_33 = arith.constant dense<0.000000e+00> : vector<5x5xf32>
    %48 = tpu.matmul %43, %45, %cst_33 {dimension_numbers = #tpu.dot_dimension_numbers<[1], [1], [0], [0], [0, 0, 1, 0], [], []>} : vector<5x8xbf16>, vector<5x8xbf16>, vector<5x5xf32> -> vector<5x5xf32>
    %cst_34 = arith.constant 0.353553385 : f32
    %49 = vector.broadcast %cst_34 : f32 to vector<5x5xf32>
    %50 = arith.mulf %48, %49 : vector<5x5xf32>
    %cst_35 = arith.constant dense<0xFF800000> : vector<5xf32>
    %51 = vector.multi_reduction <maximumf>, %50, %cst_35 [1] : vector<5x5xf32> to vector<5xf32>
    %52 = vector.shape_cast %51 : vector<5xf32> to vector<5x1xf32>
    %53 = vector.broadcast %52 : vector<5x1xf32> to vector<5x5xf32>
    %54 = arith.subf %50, %53 : vector<5x5xf32>
    %55 = math.exp %54 : vector<5x5xf32>
    %cst_36 = arith.constant dense<0.000000e+00> : vector<5xf32>
    %56 = vector.multi_reduction <add>, %55, %cst_36 [1] : vector<5x5xf32> to vector<5xf32>
    %57 = vector.shape_cast %56 : vector<5xf32> to vector<5x1xf32>
    %58 = tpu.reciprocal %57 {approx = true} : vector<5x1xf32> -> vector<5x1xf32>
    %59 = vector.broadcast %58 : vector<5x1xf32> to vector<5x5xf32>
    %60 = arith.mulf %55, %59 : vector<5x5xf32>
    %61 = arith.truncf %60 : vector<5x5xf32> to vector<5x5xbf16>
    %cst_37 = arith.constant dense<0.000000e+00> : vector<5x8xf32>
    %62 = tpu.matmul %61, %47, %cst_37 {dimension_numbers = #tpu.dot_dimension_numbers<[1], [0], [0], [1], [0, 0, 1, 1], [], []>} : vector<5x5xbf16>, vector<5x8xbf16>, vector<5x8xf32> -> vector<5x8xf32>
    %c0_38 = arith.constant 0 : index
    %c0_39 = arith.constant 0 : index
    %c24 = arith.constant 24 : index
    %63 = vector.load %arg2[%c0_38, %c0_39, %c24] : memref<1x5x32xbf16, #tpu.memory_space<vmem>>, vector<1x5x8xbf16>
    %64 = vector.shape_cast %63 : vector<1x5x8xbf16> to vector<5x8xbf16>
    %c0_40 = arith.constant 0 : index
    %c0_41 = arith.constant 0 : index
    %c24_42 = arith.constant 24 : index
    %65 = vector.load %arg3[%c0_40, %c0_41, %c24_42] : memref<1x5x32xbf16, #tpu.memory_space<vmem>>, vector<1x5x8xbf16>
    %66 = vector.shape_cast %65 : vector<1x5x8xbf16> to vector<5x8xbf16>
    %c0_43 = arith.constant 0 : index
    %c0_44 = arith.constant 0 : index
    %c24_45 = arith.constant 24 : index
    %67 = vector.load %arg4[%c0_43, %c0_44, %c24_45] : memref<1x5x32xbf16, #tpu.memory_space<vmem>>, vector<1x5x8xbf16>
    %68 = vector.shape_cast %67 : vector<1x5x8xbf16> to vector<5x8xbf16>
    %cst_46 = arith.constant dense<0.000000e+00> : vector<5x5xf32>
    %69 = tpu.matmul %64, %66, %cst_46 {dimension_numbers = #tpu.dot_dimension_numbers<[1], [1], [0], [0], [0, 0, 1, 0], [], []>} : vector<5x8xbf16>, vector<5x8xbf16>, vector<5x5xf32> -> vector<5x5xf32>
    %cst_47 = arith.constant 0.353553385 : f32
    %70 = vector.broadcast %cst_47 : f32 to vector<5x5xf32>
    %71 = arith.mulf %69, %70 : vector<5x5xf32>
    %cst_48 = arith.constant dense<0xFF800000> : vector<5xf32>
    %72 = vector.multi_reduction <maximumf>, %71, %cst_48 [1] : vector<5x5xf32> to vector<5xf32>
    %73 = vector.shape_cast %72 : vector<5xf32> to vector<5x1xf32>
    %74 = vector.broadcast %73 : vector<5x1xf32> to vector<5x5xf32>
    %75 = arith.subf %71, %74 : vector<5x5xf32>
    %76 = math.exp %75 : vector<5x5xf32>
    %cst_49 = arith.constant dense<0.000000e+00> : vector<5xf32>
    %77 = vector.multi_reduction <add>, %76, %cst_49 [1] : vector<5x5xf32> to vector<5xf32>
    %78 = vector.shape_cast %77 : vector<5xf32> to vector<5x1xf32>
    %79 = tpu.reciprocal %78 {approx = true} : vector<5x1xf32> -> vector<5x1xf32>
    %80 = vector.broadcast %79 : vector<5x1xf32> to vector<5x5xf32>
    %81 = arith.mulf %76, %80 : vector<5x5xf32>
    %82 = arith.truncf %81 : vector<5x5xf32> to vector<5x5xbf16>
    %cst_50 = arith.constant dense<0.000000e+00> : vector<5x8xf32>
    %83 = tpu.matmul %82, %68, %cst_50 {dimension_numbers = #tpu.dot_dimension_numbers<[1], [0], [0], [1], [0, 0, 1, 1], [], []>} : vector<5x5xbf16>, vector<5x8xbf16>, vector<5x8xf32> -> vector<5x8xf32>
    %84 = tpu.concatenate %20, %41, %62, %83 in 1 : vector<5x8xf32>, vector<5x8xf32>, vector<5x8xf32>, vector<5x8xf32> -> vector<5x32xf32>
    %85 = arith.truncf %84 : vector<5x32xf32> to vector<5x32xbf16>
    %c0_51 = arith.constant 0 : index
    %c0_52 = arith.constant 0 : index
    %c0_53 = arith.constant 0 : index
    %86 = vector.load %arg5[%c0_51, %c0_52, %c0_53] : memref<1x5x32xbf16, #tpu.memory_space<vmem>>, vector<1x5x32xbf16>
    %87 = vector.shape_cast %86 : vector<1x5x32xbf16> to vector<5x32xbf16>
    %88 = vector.shape_cast %85 : vector<5x32xbf16> to vector<1x5x32xbf16>
    tpu.vector_store %arg5[%c0_51, %c0_52, %c0_53], %88 {strides = array<i32>} : memref<1x5x32xbf16, #tpu.memory_space<vmem>>, vector<1x5x32xbf16>,
    return
  }
  func.func @transform_0(%arg0: i32, %arg1: i32) -> (i32, i32, i32) {
    %c0_i32 = arith.constant 0 : i32
    %c0_i32_0 = arith.constant 0 : i32
    return %arg0, %c0_i32, %arg1 : i32, i32, i32
  }
  func.func @transform_1(%arg0: i32, %arg1: i32) -> (i32, i32, i32) {
    %c0_i32 = arith.constant 0 : i32
    %c0_i32_0 = arith.constant 0 : i32
    return %arg0, %c0_i32, %arg1 : i32, i32, i32
  }
  func.func @transform_2(%arg0: i32, %arg1: i32) -> (i32, i32, i32) {
    %c0_i32 = arith.constant 0 : i32
    %c0_i32_0 = arith.constant 0 : i32
    return %arg0, %c0_i32, %arg1 : i32, i32, i32
  }
  func.func @transform_3(%arg0: i32, %arg1: i32) -> (i32, i32, i32) {
    %c0_i32 = arith.constant 0 : i32
    %c0_i32_0 = arith.constant 0 : i32
    return %arg0, %c0_i32, %arg1 : i32, i32, i32
  }
}

module attributes {stable_mosaic.version = 11 : i64} {
  func.func @_linear_kernel(%arg0: i32, %arg1: i32, %arg2: i32, %arg3: memref<16x128xbf16, #tpu.memory_space<vmem>>, %arg4: memref<128x128xbf16, #tpu.memory_space<vmem>>, %arg5: memref<1x128xbf16, #tpu.memory_space<vmem>>, %arg6: memref<16x128xbf16, #tpu.memory_space<vmem>>, %arg7: memref<16x128xbf16, #tpu.memory_space<vmem>>, %arg8: memref<16x128xf32, #tpu.memory_space<vmem>>) attributes {dimension_semantics = [#tpu.dimension_semantics<parallel>, #tpu.dimension_semantics<parallel>, #tpu.dimension_semantics<arbitrary>], iteration_bounds = array<i64: 1, 1, 1>, scalar_prefetch = 0 : i64, scratch_operands = 1 : i64, tpu.core_type = #tpu.core_type<tc>, window_params = [{transform_indices = @transform_0, window_bounds = array<i64: 16, 128>}, {transform_indices = @transform_1, window_bounds = array<i64: 128, 128>}, {transform_indices = @transform_2, window_bounds = array<i64: 1, 128>}, {transform_indices = @transform_3, window_bounds = array<i64: 16, 128>}, {transform_indices = @transform_4, window_bounds = array<i64: 16, 128>}]} {
    %c0_i32 = arith.constant 0 : i32
    %0 = arith.cmpi eq, %arg2, %c0_i32 : i32
    %1 = arith.extui %0 : i1 to i32
    %c0_i32_0 = arith.constant 0 : i32
    %2 = arith.cmpi ne, %1, %c0_i32_0 : i32
    scf.if %2 {
      %cst_10 = arith.constant 0.000000e+00 : f32
      %12 = vector.broadcast %cst_10 : f32 to vector<16x128xf32>
      %c0_11 = arith.constant 0 : index
      %c0_12 = arith.constant 0 : index
      %13 = vector.load %arg8[%c0_11, %c0_12] : memref<16x128xf32, #tpu.memory_space<vmem>>, vector<16x128xf32>
      tpu.vector_store %arg8[%c0_11, %c0_12], %12 {strides = array<i32>} : memref<16x128xf32, #tpu.memory_space<vmem>>, vector<16x128xf32>,
    } else {
    }
    %c0 = arith.constant 0 : index
    %c0_1 = arith.constant 0 : index
    %3 = vector.load %arg8[%c0, %c0_1] : memref<16x128xf32, #tpu.memory_space<vmem>>, vector<16x128xf32>
    %c0_2 = arith.constant 0 : index
    %c0_3 = arith.constant 0 : index
    %4 = vector.load %arg3[%c0_2, %c0_3] : memref<16x128xbf16, #tpu.memory_space<vmem>>, vector<16x128xbf16>
    %c0_4 = arith.constant 0 : index
    %c0_5 = arith.constant 0 : index
    %5 = vector.load %arg4[%c0_4, %c0_5] : memref<128x128xbf16, #tpu.memory_space<vmem>>, vector<128x128xbf16>
    %cst = arith.constant dense<0.000000e+00> : vector<16x128xf32>
    %6 = tpu.matmul %4, %5, %cst {dimension_numbers = #tpu.dot_dimension_numbers<[1], [0], [0], [1], [0, 0, 1, 1], [], []>} : vector<16x128xbf16>, vector<128x128xbf16>, vector<16x128xf32> -> vector<16x128xf32>
    %7 = arith.addf %3, %6 : vector<16x128xf32>
    %c0_6 = arith.constant 0 : index
    %c0_7 = arith.constant 0 : index
    %8 = vector.load %arg8[%c0_6, %c0_7] : memref<16x128xf32, #tpu.memory_space<vmem>>, vector<16x128xf32>
    tpu.vector_store %arg8[%c0_6, %c0_7], %7 {strides = array<i32>} : memref<16x128xf32, #tpu.memory_space<vmem>>, vector<16x128xf32>,
    %c0_i32_8 = arith.constant 0 : i32
    %9 = arith.cmpi eq, %arg2, %c0_i32_8 : i32
    %10 = arith.extui %9 : i1 to i32
    %c0_i32_9 = arith.constant 0 : i32
    %11 = arith.cmpi ne, %10, %c0_i32_9 : i32
    scf.if %11 {
      %c0_10 = arith.constant 0 : index
      %c0_11 = arith.constant 0 : index
      %12 = vector.load %arg8[%c0_10, %c0_11] : memref<16x128xf32, #tpu.memory_space<vmem>>, vector<16x128xf32>
      %c0_12 = arith.constant 0 : index
      %c0_13 = arith.constant 0 : index
      %13 = vector.load %arg5[%c0_12, %c0_13] : memref<1x128xbf16, #tpu.memory_space<vmem>>, vector<1x128xbf16>
      %14 = arith.extf %13 : vector<1x128xbf16> to vector<1x128xf32>
      %15 = vector.broadcast %14 : vector<1x128xf32> to vector<16x128xf32>
      %16 = arith.addf %12, %15 : vector<16x128xf32>
      %c0_14 = arith.constant 0 : index
      %c0_15 = arith.constant 0 : index
      %17 = vector.load %arg6[%c0_14, %c0_15] : memref<16x128xbf16, #tpu.memory_space<vmem>>, vector<16x128xbf16>
      %18 = arith.extf %17 : vector<16x128xbf16> to vector<16x128xf32>
      %19 = arith.addf %16, %18 : vector<16x128xf32>
      %20 = arith.truncf %19 : vector<16x128xf32> to vector<16x128xbf16>
      %c0_16 = arith.constant 0 : index
      %c0_17 = arith.constant 0 : index
      %21 = vector.load %arg7[%c0_16, %c0_17] : memref<16x128xbf16, #tpu.memory_space<vmem>>, vector<16x128xbf16>
      tpu.vector_store %arg7[%c0_16, %c0_17], %20 {strides = array<i32>} : memref<16x128xbf16, #tpu.memory_space<vmem>>, vector<16x128xbf16>,
    } else {
    }
    return
  }
  func.func @transform_0(%arg0: i32, %arg1: i32, %arg2: i32) -> (i32, i32) {
    %c0_i32 = arith.constant 0 : i32
    return %arg0, %arg2 : i32, i32
  }
  func.func @transform_1(%arg0: i32, %arg1: i32, %arg2: i32) -> (i32, i32) {
    %c0_i32 = arith.constant 0 : i32
    return %arg2, %arg1 : i32, i32
  }
  func.func @transform_2(%arg0: i32, %arg1: i32, %arg2: i32) -> (i32, i32) {
    %c0_i32 = arith.constant 0 : i32
    %c0_i32_0 = arith.constant 0 : i32
    return %c0_i32, %arg1 : i32, i32
  }
  func.func @transform_3(%arg0: i32, %arg1: i32, %arg2: i32) -> (i32, i32) {
    %c0_i32 = arith.constant 0 : i32
    return %arg0, %arg1 : i32, i32
  }
  func.func @transform_4(%arg0: i32, %arg1: i32, %arg2: i32) -> (i32, i32) {
    %c0_i32 = arith.constant 0 : i32
    return %arg0, %arg1 : i32, i32
  }
}

module attributes {stable_mosaic.version = 11 : i64} {
  func.func @_linear_kernel(%arg0: i32, %arg1: i32, %arg2: i32, %arg3: memref<16x128xbf16, #tpu.memory_space<vmem>>, %arg4: memref<128x128xbf16, #tpu.memory_space<vmem>>, %arg5: memref<1x128xbf16, #tpu.memory_space<vmem>>, %arg6: memref<16x128xbf16, #tpu.memory_space<vmem>>, %arg7: memref<16x128xf32, #tpu.memory_space<vmem>>) attributes {dimension_semantics = [#tpu.dimension_semantics<parallel>, #tpu.dimension_semantics<parallel>, #tpu.dimension_semantics<arbitrary>], iteration_bounds = array<i64: 1, 1, 1>, scalar_prefetch = 0 : i64, scratch_operands = 1 : i64, tpu.core_type = #tpu.core_type<tc>, window_params = [{transform_indices = @transform_0, window_bounds = array<i64: 16, 128>}, {transform_indices = @transform_1, window_bounds = array<i64: 128, 128>}, {transform_indices = @transform_2, window_bounds = array<i64: 1, 128>}, {transform_indices = @transform_3, window_bounds = array<i64: 16, 128>}]} {
    %c0_i32 = arith.constant 0 : i32
    %0 = arith.cmpi eq, %arg2, %c0_i32 : i32
    %1 = arith.extui %0 : i1 to i32
    %c0_i32_0 = arith.constant 0 : i32
    %2 = arith.cmpi ne, %1, %c0_i32_0 : i32
    scf.if %2 {
      %cst_10 = arith.constant 0.000000e+00 : f32
      %12 = vector.broadcast %cst_10 : f32 to vector<16x128xf32>
      %c0_11 = arith.constant 0 : index
      %c0_12 = arith.constant 0 : index
      %13 = vector.load %arg7[%c0_11, %c0_12] : memref<16x128xf32, #tpu.memory_space<vmem>>, vector<16x128xf32>
      tpu.vector_store %arg7[%c0_11, %c0_12], %12 {strides = array<i32>} : memref<16x128xf32, #tpu.memory_space<vmem>>, vector<16x128xf32>,
    } else {
    }
    %c0 = arith.constant 0 : index
    %c0_1 = arith.constant 0 : index
    %3 = vector.load %arg7[%c0, %c0_1] : memref<16x128xf32, #tpu.memory_space<vmem>>, vector<16x128xf32>
    %c0_2 = arith.constant 0 : index
    %c0_3 = arith.constant 0 : index
    %4 = vector.load %arg3[%c0_2, %c0_3] : memref<16x128xbf16, #tpu.memory_space<vmem>>, vector<16x128xbf16>
    %c0_4 = arith.constant 0 : index
    %c0_5 = arith.constant 0 : index
    %5 = vector.load %arg4[%c0_4, %c0_5] : memref<128x128xbf16, #tpu.memory_space<vmem>>, vector<128x128xbf16>
    %cst = arith.constant dense<0.000000e+00> : vector<16x128xf32>
    %6 = tpu.matmul %4, %5, %cst {dimension_numbers = #tpu.dot_dimension_numbers<[1], [0], [0], [1], [0, 0, 1, 1], [], []>} : vector<16x128xbf16>, vector<128x128xbf16>, vector<16x128xf32> -> vector<16x128xf32>
    %7 = arith.addf %3, %6 : vector<16x128xf32>
    %c0_6 = arith.constant 0 : index
    %c0_7 = arith.constant 0 : index
    %8 = vector.load %arg7[%c0_6, %c0_7] : memref<16x128xf32, #tpu.memory_space<vmem>>, vector<16x128xf32>
    tpu.vector_store %arg7[%c0_6, %c0_7], %7 {strides = array<i32>} : memref<16x128xf32, #tpu.memory_space<vmem>>, vector<16x128xf32>,
    %c0_i32_8 = arith.constant 0 : i32
    %9 = arith.cmpi eq, %arg2, %c0_i32_8 : i32
    %10 = arith.extui %9 : i1 to i32
    %c0_i32_9 = arith.constant 0 : i32
    %11 = arith.cmpi ne, %10, %c0_i32_9 : i32
    scf.if %11 {
      %c0_10 = arith.constant 0 : index
      %c0_11 = arith.constant 0 : index
      %12 = vector.load %arg7[%c0_10, %c0_11] : memref<16x128xf32, #tpu.memory_space<vmem>>, vector<16x128xf32>
      %c0_12 = arith.constant 0 : index
      %c0_13 = arith.constant 0 : index
      %13 = vector.load %arg5[%c0_12, %c0_13] : memref<1x128xbf16, #tpu.memory_space<vmem>>, vector<1x128xbf16>
      %14 = arith.extf %13 : vector<1x128xbf16> to vector<1x128xf32>
      %15 = vector.broadcast %14 : vector<1x128xf32> to vector<16x128xf32>
      %16 = arith.addf %12, %15 : vector<16x128xf32>
      %cst_14 = arith.constant 5.000000e-01 : f32
      %17 = vector.broadcast %cst_14 : f32 to vector<16x128xf32>
      %18 = arith.mulf %17, %16 : vector<16x128xf32>
      %cst_15 = arith.constant 4.471500e-02 : f32
      %19 = vector.broadcast %cst_15 : f32 to vector<16x128xf32>
      %20 = arith.mulf %19, %16 : vector<16x128xf32>
      %21 = arith.mulf %20, %16 : vector<16x128xf32>
      %22 = arith.mulf %21, %16 : vector<16x128xf32>
      %23 = arith.addf %16, %22 : vector<16x128xf32>
      %cst_16 = arith.constant 0.797884583 : f32
      %24 = vector.broadcast %cst_16 : f32 to vector<16x128xf32>
      %25 = arith.mulf %24, %23 : vector<16x128xf32>
      %26 = math.tanh %25 : vector<16x128xf32>
      %cst_17 = arith.constant 1.000000e+00 : f32
      %27 = vector.broadcast %cst_17 : f32 to vector<16x128xf32>
      %28 = arith.addf %27, %26 : vector<16x128xf32>
      %29 = arith.mulf %18, %28 : vector<16x128xf32>
      %30 = arith.truncf %29 : vector<16x128xf32> to vector<16x128xbf16>
      %c0_18 = arith.constant 0 : index
      %c0_19 = arith.constant 0 : index
      %31 = vector.load %arg6[%c0_18, %c0_19] : memref<16x128xbf16, #tpu.memory_space<vmem>>, vector<16x128xbf16>
      tpu.vector_store %arg6[%c0_18, %c0_19], %30 {strides = array<i32>} : memref<16x128xbf16, #tpu.memory_space<vmem>>, vector<16x128xbf16>,
    } else {
    }
    return
  }
  func.func @transform_0(%arg0: i32, %arg1: i32, %arg2: i32) -> (i32, i32) {
    %c0_i32 = arith.constant 0 : i32
    return %arg0, %arg2 : i32, i32
  }
  func.func @transform_1(%arg0: i32, %arg1: i32, %arg2: i32) -> (i32, i32) {
    %c0_i32 = arith.constant 0 : i32
    return %arg2, %arg1 : i32, i32
  }
  func.func @transform_2(%arg0: i32, %arg1: i32, %arg2: i32) -> (i32, i32) {
    %c0_i32 = arith.constant 0 : i32
    %c0_i32_0 = arith.constant 0 : i32
    return %c0_i32, %arg1 : i32, i32
  }
  func.func @transform_3(%arg0: i32, %arg1: i32, %arg2: i32) -> (i32, i32) {
    %c0_i32 = arith.constant 0 : i32
    return %arg0, %arg1 : i32, i32
  }
}

</mosaic_0001>

<bundles_post_ra>
// kernel: blip_base_forward.17
= control target key start
LH: loop header
LB: loop body
LE: loop exit
PB: predicated region body
PF: predicated region fallthrough
CT: control target
= control target key end

     0   :  { %vm18_vm0 = vcmask 261120   ;;  %v48_v19 = vlaneseq  ;;  %vm70_vm1 = vcmask 257024   ;;  %s128_s0 = inlined_call_operand.vmem [shape: bf16[16,32], index: 0, kind: input, shape index: {}]   ;;  %s129_s1 = inlined_call_operand.vmem [shape: bf16[1,32], index: 1, kind: input, shape index: {}]   ;;  %s130_s2 = inlined_call_operand.vmem [shape: bf16[1,32], index: 2, kind: input, shape index: {}]   ;;  %s131_s3 = inlined_call_operand.vmem [shape: bf16[16,32], index: 3, kind: output, shape index: {}]  }
   0x1   :  { %v82_v0 = vld [vmem:[%s128_s0] sm:$0xff]  }
   0x2   :  { %v83_v1 = vunpack.c.l.bf16 %v82_v0  ;;  %v84_v2 = vunpack.c.h.bf16 %v82_v0  ;;  %v49_v22 = vshrl.u32 %v48_v19, 7  ;;  %v46_v23 = vld [vmem:[%s129_s1] sm:$0x1] }
   0x3   :  { %v54_v24 = vld [vmem:[%s130_s2] sm:$0x1]  ;;  %v47_v25 = vunpack.c.l.bf16 %v46_v23 }
   0x4   :  { %v19_v3 = vsel %vm18_vm0, %v83_v1, 0.0  ;;  %v22_v4 = vsel %vm18_vm0, %v84_v2, 0.0  ;;  %v50_v26 = vsub.s32 0, %v49_v22  ;;  %v55_v27 = vunpack.c.l.bf16 %v54_v24 }
   0x5   :  { %20 = vadd.xlane.f32.xlu0 %v19_v3 }
   0x6   :  { %v51_v28 = vrot.slane %v47_v25, %v50_v26  ;;  %v59_v30 = vrot.slane %v55_v27, %v50_v26 }
   0x9   :  { %23 = vadd.xlane.f32.xlu0 %v22_v4 }
  0x8e   :  { %v21_v5 = vpop.xlane.xlu0 %20 }
  0x8f   :  { %v26_v6 = vmul.f32 0.03125, %v21_v5 }
  0x91   :  { %v28_v7 = vsub.f32 %v83_v1, %v26_v6 }
  0x92   :  { %v24_v8 = vpop.xlane.xlu0 %23 }
  0x93   :  { %v27_v9 = vmul.f32 0.03125, %v24_v8  ;;  %v30_v10 = vmul.f32 %v28_v7, %v28_v7 }
  0x95   :  { %v29_v11 = vsub.f32 %v84_v2, %v27_v9  ;;  %v32_v12 = vsel %vm18_vm0, %v30_v10, 0.0 }
  0x96   :  { %33 = vadd.xlane.f32.xlu1 %v32_v12 }
  0x97   :  { %v31_v13 = vmul.f32 %v29_v11, %v29_v11 }
  0x99   :  { %v35_v14 = vsel %vm18_vm0, %v31_v13, 0.0 }
  0x9a   :  { %36 = vadd.xlane.f32.xlu1 %v35_v14 }
 0x11f   :  { %v34_v15 = vpop.xlane.xlu1 %33 }
 0x120   :  { %v38_v16 = vmul.f32 0.03125, %v34_v15 }
 0x122   :  { %v40_v17 = vadd.f32 1e-06, %v38_v16 }
 0x123   :  { %v37_v18 = vpop.xlane.xlu1 %36 }
 0x124   :  { %85 = vrsqrt.f32 %v40_v17  ;;  %v39_v20 = vmul.f32 0.03125, %v37_v18 }
 0x126   :  { %v41_v21 = vadd.f32 1e-06, %v39_v20 }
 0x128   :  { %87 = vrsqrt.f32 %v41_v21 }
 0x131   :  { %v86_v29 = vpop.eup %85 }
 0x132   :  { %v44_v31 = vmul.f32 %v86_v29, %v28_v7 }
 0x134   :  { %v52_v32 = vmul.f32 %v51_v28, %v44_v31 }
 0x135   :  { %v88_v33 = vpop.eup %87 }
 0x136   :  { %v60_v34 = vadd.f32 %v59_v30, %v52_v32  ;;  %v45_v35 = vmul.f32 %v88_v33, %v29_v11 }
 0x138   :  { %v79_v36 = vpack.c.bf16 %v60_v34, %v60_v34  ;;  %v53_v37 = vmul.f32 %v51_v28, %v45_v35 }
 0x13a   :  { %71 = vst.msk [vmem:[%s131_s3] sm:$0xf] %vm70_vm1, %v79_v36  ;;  %v61_v38 = vadd.f32 %v59_v30, %v53_v37 }
 0x13c   :  { %v80_v39 = vpack.c.bf16 %v61_v38, %v61_v38 }
 0x13e   :  { %72 = vst.msk [vmem:[%s131_s3 + $0x4] sm:$0xf] %vm70_vm1, %v80_v39 }

// kernel: blip_base_forward.18
= control target key start
LH: loop header
LB: loop body
LE: loop exit
PB: predicated region body
PF: predicated region fallthrough
CT: control target
= control target key end

     0   :  { %v225_v0 = vmov 0.0   ;;  %vm226_vm0 = vmmov 0   ;;  %v147_v10 = vlaneseq  ;;  %s280_s1 = inlined_call_operand.vmem [shape: bf16[128,128], index: 1, kind: input, shape index: {}]   ;;  %s281_s0 = inlined_call_operand.vmem [shape: bf16[16,128], index: 0, kind: input, shape index: {}]   ;;  %s282_s2 = inlined_call_operand.vmem [shape: bf16[1,128], index: 2, kind: input, shape index: {}]   ;;  %s283_s3 = inlined_call_operand.vmem [shape: bf16[16,128], index: 3, kind: output, shape index: {}]  }
   0x1   :  { %194 = vmatprep.subr.bf16.mxu0 %v225_v0  ;;  %v216_v1 = vld [vmem:[%s280_s1 + $0x38] sm:$0xff]   ;;  %210 = vmatprep.mubr.msk.bf16.mxu0 %vm226_vm0, %v225_v0  ;;  %v217_v2 = vld [vmem:[%s280_s1 + $0x30] sm:$0xff]   ;;  %v218_v3 = vld [vmem:[%s280_s1 + $0x28] sm:$0xff]  }
   0x2   :  { %195 = vmatpush3.bf16.msra.mxu0 %v216_v1  ;;  %v219_v4 = vld [vmem:[%s280_s1 + $0x20] sm:$0xff]   ;;  %v220_v5 = vld [vmem:[%s280_s1 + $0x18] sm:$0xff]   ;;  %v221_v6 = vld [vmem:[%s280_s1 + $0x10] sm:$0xff]   ;;  %v148_v11 = vshrl.u32 %v147_v10, 7 }
   0x3   :  { %196 = vmatprep.subr.bf16.mxu0 %v225_v0  ;;  %v222_v7 = vld [vmem:[%s280_s1 + $0x8] sm:$0xff]   ;;  %v223_v8 = vld [vmem:[%s280_s1] sm:$0xff]  }
   0x4   :  { %v224_v9 = vld [vmem:[%s281_s0] sm:$0xff]   ;;  %v149_v14 = vsub.s32 0, %v148_v11 }
   0x5   :  { %v145_v12 = vld [vmem:[%s282_s2] sm:$0x1] }
   0x6   :  { %197 = vmatpush3.bf16.msra.mxu0 %v217_v2  ;;  %v146_v13 = vunpack.c.l.bf16 %v145_v12 }
   0x7   :  { %198 = vmatprep.subr.bf16.mxu0 %v225_v0 }
   0x8   :  { %v150_v16 = vrot.slane %v146_v13, %v149_v14 }
   0xa   :  { %199 = vmatpush3.bf16.msra.mxu0 %v218_v3 }
   0xb   :  { %200 = vmatprep.subr.bf16.mxu0 %v225_v0 }
   0xe   :  { %201 = vmatpush3.bf16.msra.mxu0 %v219_v4 }
   0xf   :  { %202 = vmatprep.subr.bf16.mxu0 %v225_v0 }
  0x12   :  { %203 = vmatpush3.bf16.msra.mxu0 %v220_v5 }
  0x13   :  { %204 = vmatprep.subr.bf16.mxu0 %v225_v0 }
  0x16   :  { %205 = vmatpush3.bf16.msra.mxu0 %v221_v6 }
  0x17   :  { %206 = vmatprep.subr.bf16.mxu0 %v225_v0 }
  0x1a   :  { %207 = vmatpush3.bf16.msra.mxu0 %v222_v7 }
  0x1b   :  { %208 = vmatprep.subr.bf16.mxu0 %v225_v0 }
  0x1e   :  { %209 = vmatpush3.bf16.msra.mxu0 %v223_v8 }
  0x21   :  { %211 = vmatmul.mubr.bf16.vlgmr.msra.gmra.mxu0 %v224_v9 }
  0xe1   :  { %v129_v15 = vpop.f32.mrf.mxu0 }
  0xe2   :  { %v151_v19 = vadd.f32 %v150_v16, %v129_v15 }
  0xe3   :  { %v212_v17 = vpop.f32.mrf.mxu0 }
  0xe5   :  { %v132_v18 = vpop.f32.mrf.mxu0 }
  0xe6   :  { %v152_v20 = vadd.f32 %v150_v16, %v132_v18 }
  0xe7   :  { %v213_v21 = vpop.f32.mrf.mxu0 }
  0xe8   :  { %v183_v22 = vpack.c.bf16 %v152_v20, %v151_v19 }
  0xea   :  { %184 = vst [vmem:[%s283_s3] sm:$0xff] %v183_v22  }

// kernel: blip_base_forward.16
= control target key start
LH: loop header
LB: loop body
LE: loop exit
PB: predicated region body
PF: predicated region fallthrough
CT: control target
= control target key end

     0   :  { %v205_v19 = vlaneseq  ;;  %s351_s1 = inlined_call_operand.vmem [shape: bf16[256,128], index: 1, kind: input, shape index: {}]   ;;  %s352_s0 = inlined_call_operand.vmem [shape: bf16[8,256], index: 0, kind: input, shape index: {}]   ;;  %s353_s2 = inlined_call_operand.vmem [shape: bf16[1,128], index: 2, kind: input, shape index: {}]   ;;  %s354_s3 = inlined_call_operand.vmem [shape: bf16[8,128], index: 3, kind: output, shape index: {}]  }
   0x1   :  { %v256_v0 = vld [vmem:[%s351_s1 + $0x78] sm:$0xff]   ;;  %v258_v2 = vld [vmem:[%s351_s1 + $0x70] sm:$0xff]   ;;  %v260_v4 = vld [vmem:[%s351_s1 + $0x68] sm:$0xff]  }
   0x2   :  { %v257_v1 = vld [vmem:[%s351_s1 + $0x38] sm:$0xff]   ;;  %234 = vmatprep.subr.bf16.mxu0 %v256_v0  ;;  %v259_v3 = vld [vmem:[%s351_s1 + $0x30] sm:$0xff]   ;;  %v261_v5 = vld [vmem:[%s351_s1 + $0x28] sm:$0xff]   ;;  %v206_v20 = vshrl.u32 %v205_v19, 7 }
   0x3   :  { %235 = vmatpush3.bf16.msra.mxu0 %v257_v1  ;;  %v262_v6 = vld [vmem:[%s351_s1 + $0x60] sm:$0xff]   ;;  %v264_v8 = vld [vmem:[%s351_s1 + $0x58] sm:$0xff]   ;;  %v266_v10 = vld [vmem:[%s351_s1 + $0x50] sm:$0xff]  }
   0x4   :  { %236 = vmatprep.subr.bf16.mxu0 %v258_v2  ;;  %v263_v7 = vld [vmem:[%s351_s1 + $0x20] sm:$0xff]   ;;  %v265_v9 = vld [vmem:[%s351_s1 + $0x18] sm:$0xff]   ;;  %v267_v13 = vld [vmem:[%s351_s1 + $0x10] sm:$0xff]   ;;  %v207_v23 = vsub.s32 0, %v206_v20 }
   0x5   :  { %v21_v11 = vld [vmem:[%s352_s0] sm:$0xff]  ;;  %v268_v14 = vld [vmem:[%s351_s1 + $0x48] sm:$0xff]  }
   0x6   :  { %v217_v12 = vcombine.high %v21_v11, %v21_v11  ;;  %v269_v15 = vld [vmem:[%s351_s1 + $0x8] sm:$0xff]   ;;  %v270_v16 = vld [vmem:[%s351_s1 + $0x40] sm:$0xff]   ;;  %v216_v18 = vcombine.low %v21_v11, %v21_v11 }
   0x7   :  { %237 = vmatpush3.bf16.msra.mxu0 %v259_v3  ;;  %v271_v17 = vld [vmem:[%s351_s1] sm:$0xff]  }
   0x8   :  { %238 = vmatprep.subr.bf16.mxu0 %v260_v4  ;;  %189 = vmatprep.mubr.bf16.mxu0 %v217_v12  ;;  %v203_v21 = vld [vmem:[%s353_s2] sm:$0x1] }
   0x9   :  { %v204_v22 = vunpack.c.l.bf16 %v203_v21 }
   0xb   :  { %239 = vmatpush3.bf16.msra.mxu0 %v261_v5  ;;  %v208_v25 = vrot.slane %v204_v22, %v207_v23 }
   0xc   :  { %240 = vmatprep.subr.bf16.mxu0 %v262_v6 }
   0xf   :  { %241 = vmatpush3.bf16.msra.mxu0 %v263_v7 }
  0x10   :  { %242 = vmatprep.subr.bf16.mxu0 %v264_v8 }
  0x13   :  { %243 = vmatpush3.bf16.msra.mxu0 %v265_v9 }
  0x14   :  { %244 = vmatprep.subr.bf16.mxu0 %v266_v10 }
  0x17   :  { %245 = vmatpush3.bf16.msra.mxu0 %v267_v13 }
  0x18   :  { %246 = vmatprep.subr.bf16.mxu0 %v268_v14 }
  0x1b   :  { %247 = vmatpush3.bf16.msra.mxu0 %v269_v15 }
  0x1c   :  { %248 = vmatprep.subr.bf16.mxu0 %v270_v16 }
  0x1f   :  { %249 = vmatpush3.bf16.msra.mxu0 %v271_v17 }
  0x22   :  { %190 = vmatmul.mubr.bf16.vlgmr.msra.gmra.mxu0 %v216_v18 }
  0xe2   :  { %v250_v24 = vpop.f32.mrf.mxu0 }
  0xe4   :  { %v251_v26 = vpop.f32.mrf.mxu0 }
  0xe5   :  { %v252_v27 = vadd.f32 %v251_v26, %v250_v24 }
  0xe6   :  { %v253_v28 = vpop.f32.mrf.mxu0 }
  0xe7   :  { %v209_v29 = vadd.f32 %v252_v27, %v208_v25 }
  0xe8   :  { %v254_v30 = vpop.f32.mrf.mxu0 }
  0xe9   :  { %v210_v31 = vpack.c.bf16 %v209_v29, %v209_v29 }
  0xeb   :  { %211 = vst [vmem:[%s354_s3] sm:$0xf] %v210_v31 }

// kernel: blip_base_forward.19
= control target key start
LH: loop header
LB: loop body
LE: loop exit
PB: predicated region body
PF: predicated region fallthrough
CT: control target
= control target key end

     0   :  { %s1030_s12 = smov 0   ;;  %s1032_s13 = smov 0   ;;  %s1143_s0 = inlined_call_operand.vmem [shape: bf16[2,5,32], index: 0, kind: input, shape index: {}]   ;;  %s1144_s1 = inlined_call_operand.vmem [shape: bf16[2,5,32], index: 1, kind: input, shape index: {}]   ;;  %s1145_s2 = inlined_call_operand.vmem [shape: bf16[2,5,32], index: 2, kind: input, shape index: {}]   ;;  %s1146_s3 = inlined_call_operand.vmem [shape: bf16[2,5,32], index: 3, kind: output, shape index: {}]  }
   0x1   :  { %s1034_s14 = smov 0  }
   0x2 LB: > { %s25_s15 = sadd.s32 1, %s995_s13  ;;  %p843_p0 = scmp.ge.s32.totalorder %s999_s14, 1  ;;  %s999_s14 = sphi %s1034_s14, %s13_s14   ;;  %s995_s13 = sphi %s1032_s13, %s1148_s13   ;;  %s991_s12 = sphi %s1030_s12, %s1147_s12  }
   0x3   : > { %p27_p1 = scmp.ge.s32.totalorder %s25_s15, 2  ;;  %p183_p2 = scmp.lt.s32.totalorder %s999_s14, 3 }
   0x5   : > { %s1150_s15 = smov (%p27_p1, %s25_s15), 0  ;;  %p184_p3 = pnand %p843_p0, %p183_p2 }
   0x6   : > { %p225_p4 = scmp.lt.s32.totalorder (!%p184_p3), %s991_s12, 1  ;;  %s1003_s23 = smov (!%p184_p3), 120  }
   0x7   : > { %187 = sbr.rel (%p184_p3) target bundleno = 1416 (0x588), region = 32  ;;  %s1004_s24 = smov (!%p184_p3), 112  }
   0x8   : > { %s1005_s25 = smov (!%p184_p3), 104   ;;  %s1007_s29 = smov (!%p184_p3), 8  }
   0x9   : > { %s1008_s30 = smov (!%p184_p3), 16   ;;  %s1009_s4 = smov (!%p184_p3), 24  }
   0xc   : > { %v1001_v0 = vmov 0.0   ;;  %vm1002_vm0 = vmmov 0   ;;  %s1152_s12 = smov (!%p225_p4, %s991_s12), 1  ;;  %vm257_vm1 = vcmask 64512   ;;  %vm305_vm2 = vcmask 36864  }
   0xd   : > { %877 = vmatprep.subr.bf16.mxu0 %v1001_v0  ;;  %879 = vmatprep.mubr.msk.bf16.mxu0 %vm1002_vm0, %v1001_v0  ;;  %s1054_s16 = sshll.u32 %s1152_s12, 2  ;;  %vm322_vm3 = vcmask 1041408   ;;  %vm323_vm4 = vcmask 1042432   ;;  %v1006_v18 = vmov 65535   ;;  %vm318_vm5 = vcmask 39936  }
   0xe   : > { %883 = vmatprep.subr.bf16.mxu1 %v1001_v0  ;;  %885 = vmatprep.mubr.msk.bf16.mxu1 %vm1002_vm0, %v1001_v0  ;;  %s238_s19 = scalar_lea.vmem %s1144_s1, %s1054_s16  ;;  %s231_s22 = scalar_lea.vmem %s1143_s0, %s1054_s16  ;;  %v324_v19 = vsel %vm322_vm3, 4294967295, %v1006_v18  ;;  %vm724_vm6 = vcmask 130048   ;;  %vm726_vm7 = vcmask 195584   ;;  %vm729_vm8 = vcmask 256000  }
   0xf   : > { %v255_v1 = vld [vmem:[%s238_s19] sm:$0x7]  ;;  %s245_s28 = scalar_lea.vmem %s1145_s2, %s1054_s16  ;;  %v1082_v20 = vsel %vm323_vm4, %v324_v19, 0  ;;  %s252_s7 = scalar_lea.vmem %s1146_s3, %s1054_s16  ;;  %vm730_vm9 = vsmask.f32 2304 }
  0x10   : > { %v262_v2 = vsel %vm257_vm1, %v255_v1, 0  ;;  %v254_v3 = vld [vmem:[%s231_s22] sm:$0x7]  ;;  %v851_v10 = vcombine.low %v255_v1, %v255_v1  ;;  %vm731_vm10 = vmand %vm729_vm8, %vm730_vm9 }
  0x11   : > { %878 = vmatpush3.bf16.xpose.msra.mxu0 %v262_v2  ;;  %v850_v11 = vcombine.low %v254_v3, %v254_v3  ;;  %v1080_v17 = vld [vmem:[%s245_s28] sm:$0x7] }
  0x12   : > { %895 = vmatprep.subr.bf16.mxu0 %v1001_v0  ;;  %377 = vrot.lane.b32.xlu1 %v851_v10, %s1003_s23  ;;  %v327_v21 = vand.u32 %v1082_v20, %v1080_v17 }
  0x14   : > { %884 = vmatpush3.bf16.msra.mxu1 %v327_v21 }
  0x15   : > { %889 = vmatprep.subr.bf16.mxu1 %v1001_v0 }
  0x16   : > { %372 = vrot.lane.b32.xlu1 %v850_v11, %s1003_s23 }
  0x18   : > { %880 = vmatmul.mubr.msk.bf16.vlgmr.msra.gmra.mxu0 %vm257_vm1, %v254_v3 }
  0x19   : > { %897 = vmatprep.mubr.msk.bf16.mxu0 %vm1002_vm0, %v1001_v0 }
  0x1a   : > { %489 = vrot.lane.b32.xlu1 %v850_v11, %s1004_s24 }
  0x1e   : > { %602 = vrot.lane.b32.xlu1 %v851_v10, %s1005_s25 }
  0x22   : > { %600 = vrot.lane.b32.xlu1 %v850_v11, %s1005_s25 }
  0x84   : > { %v378_v24 = vpop.permute.xlu1 %377 }
  0x85   : > { %v383_v26 = vsel %vm257_vm1, %v378_v24, 0 }
  0x88   : > { %v373_v28 = vpop.permute.xlu1 %372 }
  0x8c   : > { %v490_v30 = vpop.permute.xlu1 %489 }
  0x90   : > { %v603_v32 = vpop.permute.xlu1 %602 }
  0x91   : > { %v608_v33 = vsel %vm257_vm1, %v603_v32, 0 }
  0x94   : > { %v601_v34 = vpop.permute.xlu1 %600 }
  0xd8   : > { %v298_v4 = vpop.f32.mrf.mxu0 }
  0xd9   : > { %v304_v5 = vmul.f32 0.35355338, %v298_v4  ;;  %v853_v4 = vcombine.low %v1080_v17, %v1080_v17 }
  0xda   : > { %v881_v6 = vpop.f32.mrf.mxu0 }
  0xdb   : > { %v306_v7 = vsel %vm305_vm2, %v304_v5, -inf }
  0xdc   : > { %307 = vmax.xlane.f32.xlu0 %v306_v7  ;;  %v301_v8 = vpop.f32.mrf.mxu0 }
  0xde   : > { %v882_v9 = vpop.f32.mrf.mxu0 }
 0x165   : > { %v308_v12 = vpop.xlane.xlu0 %307 }
 0x166   : > { %v309_v13 = vsub.f32 %v304_v5, %v308_v12 }
 0x168   : > { %v310_v14 = vmul.f32 1.442695, %v309_v13 }
 0x16a   : > { %961 = vpow2.f32 %v310_v14 }
 0x177   : > { %v962_v15 = vpop.eup %961 }
 0x178   : > { %v312_v16 = vsel %vm305_vm2, %v962_v15, 0.0 }
 0x179   : > { %313 = vadd.xlane.f32.xlu0 %v312_v16 }
 0x18f   : > { %491 = vrot.lane.b32.xlu0 %v851_v10, %s1004_s24 }
 0x202   : > { %v314_v22 = vpop.xlane.xlu0 %313 }
 0x203   : > { %963 = vrcp.f32 %v314_v22 }
 0x206   : > { %v492_v29 = vpop.permute.xlu0 %491 }
 0x207   : > { %v497_v31 = vsel %vm257_vm1, %v492_v29, 0 }
 0x210   : > { %v964_v23 = vpop.eup %963 }
 0x211   : > { %v316_v25 = vmul.f32 %v964_v23, %v962_v15 }
 0x213   : > { %v317_v27 = vpack.c.bf16 %v316_v25, %v316_v25 }
 0x215   : > { %886 = vmatmul.mubr.msk.bf16.vlgmr.msra.gmra.mxu1 %vm318_vm5, %v317_v27 }
 0x216   : > { %890 = vmatpush3.bf16.xpose.msra.mxu1 %v383_v26  ;;  %891 = vmatprep.mubr.msk.bf16.mxu1 %vm1002_vm0, %v1001_v0 }
 0x217   : > { %901 = vmatprep.subr.bf16.mxu1 %v1001_v0 }
 0x21d   : > { %892 = vmatmul.mubr.msk.bf16.vlgmr.msra.gmra.mxu1 %vm257_vm1, %v373_v28 }
 0x21e   : > { %902 = vmatpush3.bf16.xpose.msra.mxu1 %v497_v31  ;;  %903 = vmatprep.mubr.msk.bf16.mxu1 %vm1002_vm0, %v1001_v0 }
 0x21f   : > { %913 = vmatprep.subr.bf16.mxu1 %v1001_v0 }
 0x225   : > { %904 = vmatmul.mubr.msk.bf16.vlgmr.msra.gmra.mxu1 %vm257_vm1, %v490_v30 }
 0x226   : > { %914 = vmatpush3.bf16.xpose.msra.mxu1 %v608_v33  ;;  %915 = vmatprep.mubr.msk.bf16.mxu1 %vm1002_vm0, %v1001_v0 }
 0x22d   : > { %916 = vmatmul.mubr.msk.bf16.vlgmr.msra.gmra.mxu1 %vm257_vm1, %v601_v34 }
 0x2d5   : > { %v1103_v35 = vpop.f32.mrf.mxu1 }
 0x2d7   : > { %v887_v36 = vpop.f32.mrf.mxu1 }
 0x2d9   : > { %v366_v37 = vpop.f32.mrf.mxu1 }
 0x2db   : > { %v888_v38 = vpop.f32.mrf.mxu1 }
 0x2dd   : > { %v419_v39 = vpop.f32.mrf.mxu1 }
 0x2de   : > { %v425_v40 = vmul.f32 0.35355338, %v419_v39 }
 0x2df   : > { %v893_v41 = vpop.f32.mrf.mxu1 }
 0x2e0   : > { %v426_v42 = vsel %vm305_vm2, %v425_v40, -inf }
 0x2e1   : > { %427 = vmax.xlane.f32.xlu1 %v426_v42  ;;  %v422_v43 = vpop.f32.mrf.mxu1 }
 0x2e3   : > { %v894_v44 = vpop.f32.mrf.mxu1 }
 0x2e5   : > { %v533_v45 = vpop.f32.mrf.mxu1 }
 0x2e6   : > { %v539_v46 = vmul.f32 0.35355338, %v533_v45  ;;  %v732_v45 = vld [vmem:[%s252_s7] sm:$0x7] }
 0x2e7   : > { %v905_v47 = vpop.f32.mrf.mxu1 }
 0x2e8   : > { %v540_v48 = vsel %vm305_vm2, %v539_v46, -inf }
 0x2e9   : > { %541 = vmax.xlane.f32.xlu0 %v540_v48  ;;  %v536_v49 = vpop.f32.mrf.mxu1 }
 0x2eb   : > { %v906_v50 = vpop.f32.mrf.mxu1 }
 0x2ed   : > { %v644_v51 = vpop.f32.mrf.mxu1 }
 0x2ee   : > { %v650_v52 = vmul.f32 0.35355338, %v644_v51 }
 0x2ef   : > { %v917_v53 = vpop.f32.mrf.mxu1 }
 0x2f0   : > { %v651_v54 = vsel %vm305_vm2, %v650_v52, -inf }
 0x2f1   : > { %652 = vmax.xlane.f32.xlu1 %v651_v54  ;;  %v647_v55 = vpop.f32.mrf.mxu1 }
 0x2f3   : > { %v918_v56 = vpop.f32.mrf.mxu1 }
 0x36a   : > { %v428_v57 = vpop.xlane.xlu1 %427 }
 0x36b   : > { %v429_v58 = vsub.f32 %v425_v40, %v428_v57 }
 0x36d   : > { %v430_v59 = vmul.f32 1.442695, %v429_v58 }
 0x36f   : > { %965 = vpow2.f32 %v430_v59 }
 0x372   : > { %v542_v60 = vpop.xlane.xlu0 %541 }
 0x373   : > { %v543_v61 = vsub.f32 %v539_v46, %v542_v60 }
 0x375   : > { %v544_v62 = vmul.f32 1.442695, %v543_v61 }
 0x377   : > { %967 = vpow2.f32 %v544_v62 }
 0x37a   : > { %v653_v5 = vpop.xlane.xlu1 %652 }
 0x37b   : > { %v654_v6 = vsub.f32 %v650_v52, %v653_v5 }
 0x37c   : > { %v966_v63 = vpop.eup %965 }
 0x37d   : > { %v432_v1 = vsel %vm305_vm2, %v966_v63, 0.0  ;;  %v655_v7 = vmul.f32 1.442695, %v654_v6 }
 0x37e   : > { %433 = vadd.xlane.f32.xlu1 %v432_v1 }
 0x37f   : > { %969 = vpow2.f32 %v655_v7 }
 0x384   : > { %v968_v2 = vpop.eup %967 }
 0x385   : > { %v546_v3 = vsel %vm305_vm2, %v968_v2, 0.0 }
 0x386   : > { %547 = vadd.xlane.f32.xlu0 %v546_v3 }
 0x38c   : > { %v970_v8 = vpop.eup %969 }
 0x38d   : > { %v657_v9 = vsel %vm305_vm2, %v970_v8, 0.0 }
 0x38f   : > { %552 = vrot.lane.b32.xlu1 %v853_v4, %s1004_s24 }
 0x39c   : > { %441 = vrot.lane.b32.xlu0 %v853_v4, %s1003_s23 }
 0x3b3   : > { %658 = vadd.xlane.f32.xlu1 %v657_v9 }
 0x3c4   : > { %663 = vrot.lane.b32.xlu1 %v853_v4, %s1005_s25 }
 0x407   : > { %v434_v10 = vpop.xlane.xlu1 %433 }
 0x408   : > { %971 = vrcp.f32 %v434_v10 }
 0x40b   : > { %v553_v15 = vpop.permute.xlu1 %552 }
 0x40c   : > { %v558_v18 = vand.u32 %v553_v15, %v1082_v20 }
 0x40f   : > { %v548_v11 = vpop.xlane.xlu0 %547 }
 0x410   : > { %973 = vrcp.f32 %v548_v11 }
 0x413   : > { %v442_v12 = vpop.permute.xlu0 %441 }
 0x414   : > { %v447_v13 = vand.u32 %v442_v12, %v1082_v20 }
 0x415   : > { %v972_v14 = vpop.eup %971 }
 0x416   : > { %896 = vmatpush3.bf16.msra.mxu0 %v447_v13  ;;  %v436_v16 = vmul.f32 %v972_v14, %v966_v63 }
 0x417   : > { %907 = vmatprep.subr.bf16.mxu0 %v1001_v0 }
 0x418   : > { %v437_v17 = vpack.c.bf16 %v436_v16, %v436_v16 }
 0x41a   : > { %898 = vmatmul.mubr.msk.bf16.vlgmr.msra.gmra.mxu0 %vm318_vm5, %v437_v17 }
 0x41b   : > { %908 = vmatpush3.bf16.msra.mxu0 %v558_v18  ;;  %909 = vmatprep.mubr.msk.bf16.mxu0 %vm1002_vm0, %v1001_v0 }
 0x41c   : > { %919 = vmatprep.subr.bf16.mxu0 %v1001_v0 }
 0x41d   : > { %v974_v19 = vpop.eup %973 }
 0x41e   : > { %v550_v21 = vmul.f32 %v974_v19, %v968_v2 }
 0x420   : > { %v551_v22 = vpack.c.bf16 %v550_v21, %v550_v21 }
 0x422   : > { %910 = vmatmul.mubr.msk.bf16.vlgmr.msra.gmra.mxu0 %vm318_vm5, %v551_v22 }
 0x423   : > { %921 = vmatprep.mubr.msk.bf16.mxu0 %vm1002_vm0, %v1001_v0 }
 0x43c   : > { %v659_v23 = vpop.xlane.xlu1 %658 }
 0x43d   : > { %975 = vrcp.f32 %v659_v23 }
 0x440   : > { %v664_v24 = vpop.permute.xlu1 %663 }
 0x441   : > { %v669_v25 = vand.u32 %v664_v24, %v1082_v20 }
 0x443   : > { %920 = vmatpush3.bf16.msra.mxu0 %v669_v25 }
 0x44a   : > { %v976_v26 = vpop.eup %975 }
 0x44b   : > { %v661_v27 = vmul.f32 %v976_v26, %v970_v8 }
 0x44d   : > { %v662_v28 = vpack.c.bf16 %v661_v27, %v661_v27 }
 0x44f   : > { %922 = vmatmul.mubr.msk.bf16.vlgmr.msra.gmra.mxu0 %vm318_vm5, %v662_v28 }
 0x4da   : > { %v483_v29 = vpop.f32.mrf.mxu0 }
 0x4db   : > { %712 = vrot.lane.b32.xlu0 %v483_v29, %s1007_s29 }
 0x4dc   : > { %v899_v30 = vpop.f32.mrf.mxu0 }
 0x4de   : > { %v486_v31 = vpop.f32.mrf.mxu0 }
 0x4e0   : > { %v900_v32 = vpop.f32.mrf.mxu0 }
 0x4e2   : > { %v594_v33 = vpop.f32.mrf.mxu0 }
 0x4e3   : > { %716 = vrot.lane.b32.xlu1 %v594_v33, %s1008_s30 }
 0x4e4   : > { %v911_v0 = vpop.f32.mrf.mxu0 }
 0x4e6   : > { %v597_v34 = vpop.f32.mrf.mxu0 }
 0x4e8   : > { %v912_v36 = vpop.f32.mrf.mxu0 }
 0x50f   : > { %v705_v20 = vpop.f32.mrf.mxu0 }
 0x510   : > { %720 = vrot.lane.b32.xlu0 %v705_v20, %s1009_s4 }
 0x511   : > { %v923_v37 = vpop.f32.mrf.mxu0 }
 0x513   : > { %v708_v38 = vpop.f32.mrf.mxu0 }
 0x515   : > { %v924_v39 = vpop.f32.mrf.mxu0 }
 0x54d   : > { %v713_v40 = vpop.permute.xlu0 %712 }
 0x54e   : > { %v723_v42 = vsel %vm257_vm1, %v1103_v35, %v713_v40 }
 0x555   : > { %v717_v41 = vpop.permute.xlu1 %716 }
 0x556   : > { %v725_v43 = vsel %vm724_vm6, %v723_v42, %v717_v41 }
 0x582   : > { %v721_v44 = vpop.permute.xlu0 %720 }
 0x583   : > { %v727_v46 = vsel %vm726_vm7, %v725_v43, %v721_v44 }
 0x584   : > { %v728_v47 = vpack.c.bf16 %v727_v46, %v727_v46 }
 0x586   : > { %v733_v48 = vsel %vm731_vm10, %v728_v47, %v732_v45 }
 0x587   : > { %734 = vst [vmem:[%s252_s7] sm:$0x7] %v733_v48 }
 0x588 PF: > { %s13_s14 = sadd.s32 1, %s999_s14   ;;  %s1147_s12 = smov %s995_s13 }
 0x589   : > { %p10_p5 = scmp.ge.s32.totalorder %s13_s14, 4   ;;  %s1148_s13 = smov %s1150_s15 }
 0x58b   :  { %12 = sbr.rel (!%p10_p5) target bundleno = 2 (0x2), region = 68 }

// kernel: blip_base_forward.20
= control target key start
LH: loop header
LB: loop body
LE: loop exit
PB: predicated region body
PF: predicated region fallthrough
CT: control target
= control target key end

     0   :  { %v238_v0 = vmov 0.0   ;;  %vm239_vm0 = vmmov 0   ;;  %v150_v10 = vlaneseq  ;;  %s301_s1 = inlined_call_operand.vmem [shape: bf16[128,128], index: 1, kind: input, shape index: {}]   ;;  %s302_s0 = inlined_call_operand.vmem [shape: bf16[16,128], index: 0, kind: input, shape index: {}]   ;;  %s303_s2 = inlined_call_operand.vmem [shape: bf16[1,128], index: 2, kind: input, shape index: {}]   ;;  %s304_s3 = inlined_call_operand.vmem [shape: bf16[16,128], index: 3, kind: input, shape index: {}]   ;;  %s305_s4 = inlined_call_operand.vmem [shape: bf16[16,128], index: 4, kind: output, shape index: {}]  }
   0x1   :  { %207 = vmatprep.subr.bf16.mxu0 %v238_v0  ;;  %v229_v1 = vld [vmem:[%s301_s1 + $0x38] sm:$0xff]   ;;  %223 = vmatprep.mubr.msk.bf16.mxu0 %vm239_vm0, %v238_v0  ;;  %v230_v2 = vld [vmem:[%s301_s1 + $0x30] sm:$0xff]   ;;  %v231_v3 = vld [vmem:[%s301_s1 + $0x28] sm:$0xff]  }
   0x2   :  { %208 = vmatpush3.bf16.msra.mxu0 %v229_v1  ;;  %v232_v4 = vld [vmem:[%s301_s1 + $0x20] sm:$0xff]   ;;  %v233_v5 = vld [vmem:[%s301_s1 + $0x18] sm:$0xff]   ;;  %v234_v6 = vld [vmem:[%s301_s1 + $0x10] sm:$0xff]   ;;  %v151_v11 = vshrl.u32 %v150_v10, 7 }
   0x3   :  { %209 = vmatprep.subr.bf16.mxu0 %v238_v0  ;;  %v235_v7 = vld [vmem:[%s301_s1 + $0x8] sm:$0xff]   ;;  %v236_v8 = vld [vmem:[%s301_s1] sm:$0xff]  }
   0x4   :  { %v237_v9 = vld [vmem:[%s302_s0] sm:$0xff]   ;;  %v152_v14 = vsub.s32 0, %v151_v11 }
   0x5   :  { %v148_v12 = vld [vmem:[%s303_s2] sm:$0x1] }
   0x6   :  { %210 = vmatpush3.bf16.msra.mxu0 %v230_v2  ;;  %v149_v13 = vunpack.c.l.bf16 %v148_v12  ;;  %v190_v17 = vld [vmem:[%s304_s3] sm:$0xff]  }
   0x7   :  { %211 = vmatprep.subr.bf16.mxu0 %v238_v0  ;;  %v191_v20 = vunpack.c.l.bf16 %v190_v17  ;;  %v192_v21 = vunpack.c.h.bf16 %v190_v17 }
   0x8   :  { %v153_v15 = vrot.slane %v149_v13, %v152_v14 }
   0xa   :  { %212 = vmatpush3.bf16.msra.mxu0 %v231_v3 }
   0xb   :  { %213 = vmatprep.subr.bf16.mxu0 %v238_v0 }
   0xe   :  { %214 = vmatpush3.bf16.msra.mxu0 %v232_v4 }
   0xf   :  { %215 = vmatprep.subr.bf16.mxu0 %v238_v0 }
  0x12   :  { %216 = vmatpush3.bf16.msra.mxu0 %v233_v5 }
  0x13   :  { %217 = vmatprep.subr.bf16.mxu0 %v238_v0 }
  0x16   :  { %218 = vmatpush3.bf16.msra.mxu0 %v234_v6 }
  0x17   :  { %219 = vmatprep.subr.bf16.mxu0 %v238_v0 }
  0x1a   :  { %220 = vmatpush3.bf16.msra.mxu0 %v235_v7 }
  0x1b   :  { %221 = vmatprep.subr.bf16.mxu0 %v238_v0 }
  0x1e   :  { %222 = vmatpush3.bf16.msra.mxu0 %v236_v8 }
  0x21   :  { %224 = vmatmul.mubr.bf16.vlgmr.msra.gmra.mxu0 %v237_v9 }
  0xe1   :  { %v132_v16 = vpop.f32.mrf.mxu0 }
  0xe2   :  { %v154_v19 = vadd.f32 %v153_v15, %v132_v16 }
  0xe3   :  { %v225_v18 = vpop.f32.mrf.mxu0 }
  0xe4   :  { %v160_v25 = vadd.f32 %v191_v20, %v154_v19 }
  0xe5   :  { %v135_v22 = vpop.f32.mrf.mxu0 }
  0xe6   :  { %v155_v23 = vadd.f32 %v153_v15, %v135_v22 }
  0xe7   :  { %v226_v24 = vpop.f32.mrf.mxu0 }
  0xe8   :  { %v161_v26 = vadd.f32 %v192_v21, %v155_v23 }
  0xea   :  { %v196_v27 = vpack.c.bf16 %v161_v26, %v160_v25 }
  0xec   :  { %197 = vst [vmem:[%s305_s4] sm:$0xff] %v196_v27  }

// kernel: blip_base_forward.22
= control target key start
LH: loop header
LB: loop body
LE: loop exit
PB: predicated region body
PF: predicated region fallthrough
CT: control target
= control target key end

     0   :  { %v247_v0 = vmov 0.0   ;;  %vm248_vm0 = vmmov 0   ;;  %v147_v10 = vlaneseq  ;;  %s302_s1 = inlined_call_operand.vmem [shape: bf16[128,128], index: 1, kind: input, shape index: {}]   ;;  %s303_s0 = inlined_call_operand.vmem [shape: bf16[16,128], index: 0, kind: input, shape index: {}]   ;;  %s304_s2 = inlined_call_operand.vmem [shape: bf16[1,128], index: 2, kind: input, shape index: {}]   ;;  %s305_s3 = inlined_call_operand.vmem [shape: bf16[16,128], index: 3, kind: output, shape index: {}]  }
   0x1   :  { %212 = vmatprep.subr.bf16.mxu0 %v247_v0  ;;  %v234_v1 = vld [vmem:[%s302_s1 + $0x38] sm:$0xff]   ;;  %228 = vmatprep.mubr.msk.bf16.mxu0 %vm248_vm0, %v247_v0  ;;  %v235_v2 = vld [vmem:[%s302_s1 + $0x30] sm:$0xff]   ;;  %v236_v3 = vld [vmem:[%s302_s1 + $0x28] sm:$0xff]  }
   0x2   :  { %213 = vmatpush3.bf16.msra.mxu0 %v234_v1  ;;  %v237_v4 = vld [vmem:[%s302_s1 + $0x20] sm:$0xff]   ;;  %v238_v5 = vld [vmem:[%s302_s1 + $0x18] sm:$0xff]   ;;  %v239_v6 = vld [vmem:[%s302_s1 + $0x10] sm:$0xff]   ;;  %v148_v11 = vshrl.u32 %v147_v10, 7 }
   0x3   :  { %214 = vmatprep.subr.bf16.mxu0 %v247_v0  ;;  %v240_v7 = vld [vmem:[%s302_s1 + $0x8] sm:$0xff]   ;;  %v241_v8 = vld [vmem:[%s302_s1] sm:$0xff]  }
   0x4   :  { %v242_v9 = vld [vmem:[%s303_s0] sm:$0xff]   ;;  %v149_v14 = vsub.s32 0, %v148_v11 }
   0x5   :  { %v145_v12 = vld [vmem:[%s304_s2] sm:$0x1] }
   0x6   :  { %215 = vmatpush3.bf16.msra.mxu0 %v235_v2  ;;  %v146_v13 = vunpack.c.l.bf16 %v145_v12 }
   0x7   :  { %216 = vmatprep.subr.bf16.mxu0 %v247_v0 }
   0x8   :  { %v150_v15 = vrot.slane %v146_v13, %v149_v14 }
   0xa   :  { %217 = vmatpush3.bf16.msra.mxu0 %v236_v3 }
   0xb   :  { %218 = vmatprep.subr.bf16.mxu0 %v247_v0 }
   0xe   :  { %219 = vmatpush3.bf16.msra.mxu0 %v237_v4 }
   0xf   :  { %220 = vmatprep.subr.bf16.mxu0 %v247_v0 }
  0x12   :  { %221 = vmatpush3.bf16.msra.mxu0 %v238_v5 }
  0x13   :  { %222 = vmatprep.subr.bf16.mxu0 %v247_v0 }
  0x16   :  { %223 = vmatpush3.bf16.msra.mxu0 %v239_v6 }
  0x17   :  { %224 = vmatprep.subr.bf16.mxu0 %v247_v0 }
  0x1a   :  { %225 = vmatpush3.bf16.msra.mxu0 %v240_v7 }
  0x1b   :  { %226 = vmatprep.subr.bf16.mxu0 %v247_v0 }
  0x1e   :  { %227 = vmatpush3.bf16.msra.mxu0 %v241_v8 }
  0x21   :  { %229 = vmatmul.mubr.bf16.vlgmr.msra.gmra.mxu0 %v242_v9 }
  0xe1   :  { %v129_v16 = vpop.f32.mrf.mxu0 }
  0xe2   :  { %v151_v17 = vadd.f32 %v150_v15, %v129_v16 }
  0xe3   :  { %v230_v18 = vpop.f32.mrf.mxu0 }
  0xe4   :  { %v155_v19 = vmul.f32 0.044715, %v151_v17  ;;  %v153_v35 = vmul.f32 0.5, %v151_v17 }
  0xe5   :  { %v132_v20 = vpop.f32.mrf.mxu0 }
  0xe6   :  { %v157_v21 = vmul.f32 %v155_v19, %v151_v17  ;;  %v152_v22 = vadd.f32 %v150_v15, %v132_v20 }
  0xe7   :  { %v231_v23 = vpop.f32.mrf.mxu0 }
  0xe8   :  { %v159_v24 = vmul.f32 %v157_v21, %v151_v17  ;;  %v156_v25 = vmul.f32 0.044715, %v152_v22  ;;  %v154_v36 = vmul.f32 0.5, %v152_v22 }
  0xea   :  { %v161_v26 = vadd.f32 %v159_v24, %v151_v17  ;;  %v158_v27 = vmul.f32 %v156_v25, %v152_v22 }
  0xec   :  { %v163_v28 = vmul.f32 0.7978846, %v161_v26  ;;  %v160_v29 = vmul.f32 %v158_v27, %v152_v22 }
  0xee   :  { %243 = vtanh.f32 %v163_v28  ;;  %v162_v30 = vadd.f32 %v160_v29, %v152_v22 }
  0xf0   :  { %v164_v31 = vmul.f32 0.7978846, %v162_v30 }
  0xf2   :  { %245 = vtanh.f32 %v164_v31 }
  0xfb   :  { %v244_v32 = vpop.eup %243 }
  0xfc   :  { %v167_v33 = vadd.f32 1.0, %v244_v32 }
  0xfe   :  { %v169_v38 = vmul.f32 %v167_v33, %v153_v35 }
  0xff   :  { %v246_v34 = vpop.eup %245 }
 0x100   :  { %v168_v37 = vadd.f32 1.0, %v246_v34 }
 0x102   :  { %v170_v39 = vmul.f32 %v168_v37, %v154_v36 }
 0x104   :  { %v201_v40 = vpack.c.bf16 %v170_v39, %v169_v38 }
 0x106   :  { %202 = vst [vmem:[%s305_s3] sm:$0xff] %v201_v40  }

</bundles_post_ra>
